<compile_context>
chip_gen: v6e
topology: v6e:2x2x1
jax: 0.10.0
libtpu: 0.0.40
codegen_flags: <defaults>
</compile_context>

<pallas_src>
import functools

import jax
import jax.numpy as jnp
from jax.experimental import pallas as pl
from jax.experimental.pallas import tpu as pltpu


def _make_kernel(ksize, stride, OH, OW, Cin, Cout):
    """Fused conv(im2col-in-VMEM) + folded-BN shift + LeakyReLU(0.1) kernel."""

    def kernel(x_ref, w_ref, shift_ref, o_ref):
        # x_ref:     (Hp, Wp, Cin)  bf16  -- one padded image (batch squeezed)
        # w_ref:     (ksize*ksize, Cin, Cout) f32, BN scale already folded in
        # shift_ref: (1, Cout) f32
        # o_ref:     (OH*OW, Cout) f32
        x = x_ref[...].astype(jnp.float32)       # bf16 HBM stream, f32 compute
        acc = jnp.zeros((OH * OW, Cout), jnp.float32)
        for kh in range(ksize):                  # statically unrolled k*k taps
            for kw in range(ksize):
                xs = x[kh:kh + stride * (OH - 1) + 1:stride,
                       kw:kw + stride * (OW - 1) + 1:stride, :]   # (OH, OW, Cin)
                acc = acc + jnp.dot(
                    xs.reshape(OH * OW, Cin),
                    w_ref[kh * ksize + kw],
                    preferred_element_type=jnp.float32,
                )
        y = acc + shift_ref[...]                 # folded BatchNorm shift
        o_ref[...] = jnp.where(y > 0, y, 0.1 * y).astype(o_ref.dtype)  # LeakyReLU(0.1)

    return kernel


@functools.partial(jax.jit, static_argnames=("ksize", "stride", "eps"))
def base_conv_forward(x_nchw, weight, gamma, beta, run_mean, run_var,
                      *, ksize, stride, eps=1e-3):
    """BaseConv forward. x_nchw: (N, Cin, H, W). weight: (Cout, Cin, kh, kw)."""
    pad = (ksize - 1) // 2
    N, Cin, H, W = x_nchw.shape
    Cout = weight.shape[0]
    OH = (H + 2 * pad - ksize) // stride + 1
    OW = (W + 2 * pad - ksize) // stride + 1
    Hp, Wp = H + 2 * pad, W + 2 * pad

    # NCHW -> NHWC, cast the (dominant) activation stream to bf16, apply the
    # conv padding once. No im2col buffer is ever written to HBM.
    x_nhwc = jnp.transpose(x_nchw, (0, 2, 3, 1)).astype(jnp.bfloat16)
    x_pad = jnp.pad(x_nhwc, ((0, 0), (pad, pad), (pad, pad), (0, 0)))

    # Fold BatchNorm (inference) into the weights:  conv(x) * scale + shift.
    scale = gamma / jnp.sqrt(run_var + eps)                       # (Cout,)
    shift2d = (beta - run_mean * scale).astype(jnp.float32).reshape(1, Cout)
    # (Cout, Cin, kh, kw) -> (kh, kw, Cin, Cout) -> (k*k, Cin, Cout), scale folded.
    w = jnp.transpose(weight, (2, 3, 1, 0)).reshape(ksize * ksize, Cin, Cout)
    w = (w * scale[None, None, :]).astype(jnp.float32)

    kernel = _make_kernel(ksize, stride, OH, OW, Cin, Cout)

    out = pl.pallas_call(
        kernel,
        out_shape=jax.ShapeDtypeStruct((N, OH * OW, Cout), jnp.float32),
        grid_spec=pltpu.PrefetchScalarGridSpec(
            num_scalar_prefetch=0,
            grid=(N,),
            in_specs=[
                pl.BlockSpec((None, Hp, Wp, Cin), lambda n: (n, 0, 0, 0)),
                pl.BlockSpec((ksize * ksize, Cin, Cout), lambda n: (0, 0, 0)),
                pl.BlockSpec((1, Cout), lambda n: (0, 0)),
            ],
            out_specs=pl.BlockSpec((None, OH * OW, Cout), lambda n: (n, 0, 0)),
        ),
        compiler_params=pltpu.CompilerParams(
            dimension_semantics=("parallel",),        # N>=2 -> both v7x TCs busy
            vmem_limit_bytes=32 * 1024 * 1024,        # explicit, fits v7x 64 MiB
        ),
    )(x_pad, w, shift2d)

    out = out.reshape(N, OH, OW, Cout)
    return jnp.transpose(out, (0, 3, 1, 2))           # back to NCHW


def _reference(x_nchw, weight, gamma, beta, run_mean, run_var, *, ksize, stride, eps=1e-3):
    """Pure-JAX f32 reference for verification."""
    pad = (ksize - 1) // 2
    y = jax.lax.conv_general_dilated(
        x_nchw.astype(jnp.float32), weight.astype(jnp.float32),
        window_strides=(stride, stride), padding=[(pad, pad), (pad, pad)],
        dimension_numbers=("NCHW", "OIHW", "NCHW"))
    scale = gamma / jnp.sqrt(run_var + eps)
    shift = beta - run_mean * scale
    y = y * scale[None, :, None, None] + shift[None, :, None, None]
    return jnp.where(y > 0, y, 0.1 * y)


if __name__ == "__main__":
    # BaseConv(in_chl=4, out_chl=8, ksize=3, stride=1, with_bn=True, activate='lrelu')
    in_chl, out_chl, ksize, stride = 4, 8, 3, 1
    N, H, W = 2, 16, 16

    key = jax.random.PRNGKey(0)
    kx, kw, kg, kb, km, kv = jax.random.split(key, 6)

    x = jax.random.normal(kx, (N, in_chl, H, W), dtype=jnp.float32)
    weight = jax.random.normal(kw, (out_chl, in_chl, ksize, ksize), dtype=jnp.float32) * 0.1
    gamma = jax.random.normal(kg, (out_chl,), dtype=jnp.float32) * 0.1 + 1.0
    beta = jax.random.normal(kb, (out_chl,), dtype=jnp.float32) * 0.1
    run_mean = jax.random.normal(km, (out_chl,), dtype=jnp.float32) * 0.1
    run_var = jax.random.uniform(kv, (out_chl,), dtype=jnp.float32, minval=0.5, maxval=1.5)

    out = base_conv_forward(x, weight, gamma, beta, run_mean, run_var,
                            ksize=ksize, stride=stride)
    out = jax.block_until_ready(out)

    ref = _reference(x, weight, gamma, beta, run_mean, run_var,
                     ksize=ksize, stride=stride)
    assert out.shape == (N, out_chl, H, W), out.shape
    # Tolerance accounts for the bf16 quantization of the activation stream
    # (f32 accumulation keeps the error ~1e-3).
    assert jnp.allclose(out, ref, atol=1e-2, rtol=1e-2), float(jnp.max(jnp.abs(out - ref)))

    print("KERNEL_OK")
</pallas_src>

<mosaic_0001>
module attributes {stable_mosaic.version = 11 : i64} {
  func.func @kernel(%arg0: i32, %arg1: memref<1x18x18x4xbf16, #tpu.memory_space<vmem>>, %arg2: memref<9x4x8xf32, #tpu.memory_space<vmem>>, %arg3: memref<1x8xf32, #tpu.memory_space<vmem>>, %arg4: memref<1x256x8xf32, #tpu.memory_space<vmem>>) attributes {dimension_semantics = [#tpu.dimension_semantics<parallel>], iteration_bounds = array<i64: 2>, scalar_prefetch = 0 : i64, scratch_operands = 0 : i64, tpu.core_type = #tpu.core_type<tc>, window_params = [{transform_indices = @transform_0, window_bounds = array<i64: 1, 18, 18, 4>}, {pipeline_mode = #tpu.pipeline_mode<synchronous>, transform_indices = @transform_1, window_bounds = array<i64: 9, 4, 8>}, {pipeline_mode = #tpu.pipeline_mode<synchronous>, transform_indices = @transform_2, window_bounds = array<i64: 1, 8>}, {transform_indices = @transform_3, window_bounds = array<i64: 1, 256, 8>}]} {
    %c0 = arith.constant 0 : index
    %c0_0 = arith.constant 0 : index
    %c0_1 = arith.constant 0 : index
    %c0_2 = arith.constant 0 : index
    %0 = vector.load %arg1[%c0, %c0_0, %c0_1, %c0_2] : memref<1x18x18x4xbf16, #tpu.memory_space<vmem>>, vector<1x18x18x4xbf16>
    %1 = vector.shape_cast %0 : vector<1x18x18x4xbf16> to vector<18x18x4xbf16>
    %2 = arith.extf %1 : vector<18x18x4xbf16> to vector<18x18x4xf32>
    %cst = arith.constant 0.000000e+00 : f32
    %3 = vector.broadcast %cst : f32 to vector<256x8xf32>
    %4 = vector.extract_strided_slice %2 {offsets = [0, 0, 0], sizes = [16, 16, 4], strides = [1, 1, 1]} : vector<18x18x4xf32> to vector<16x16x4xf32>
    %5 = vector.shape_cast %4 : vector<16x16x4xf32> to vector<256x4xf32>
    %c0_3 = arith.constant 0 : index
    %c0_4 = arith.constant 0 : index
    %c0_5 = arith.constant 0 : index
    %6 = vector.load %arg2[%c0_3, %c0_4, %c0_5] : memref<9x4x8xf32, #tpu.memory_space<vmem>>, vector<1x4x8xf32>
    %7 = vector.shape_cast %6 : vector<1x4x8xf32> to vector<4x8xf32>
    %cst_6 = arith.constant dense<0.000000e+00> : vector<256x8xf32>
    %8 = tpu.matmul %5, %7, %cst_6 {dimension_numbers = #tpu.dot_dimension_numbers<[1], [0], [0], [1], [0, 0, 1, 1], [], []>} : vector<256x4xf32>, vector<4x8xf32>, vector<256x8xf32> -> vector<256x8xf32>
    %9 = arith.addf %3, %8 : vector<256x8xf32>
    %10 = vector.extract_strided_slice %2 {offsets = [0, 1, 0], sizes = [16, 16, 4], strides = [1, 1, 1]} : vector<18x18x4xf32> to vector<16x16x4xf32>
    %11 = vector.shape_cast %10 : vector<16x16x4xf32> to vector<256x4xf32>
    %c1 = arith.constant 1 : index
    %c0_7 = arith.constant 0 : index
    %c0_8 = arith.constant 0 : index
    %12 = vector.load %arg2[%c1, %c0_7, %c0_8] : memref<9x4x8xf32, #tpu.memory_space<vmem>>, vector<1x4x8xf32>
    %13 = vector.shape_cast %12 : vector<1x4x8xf32> to vector<4x8xf32>
    %cst_9 = arith.constant dense<0.000000e+00> : vector<256x8xf32>
    %14 = tpu.matmul %11, %13, %cst_9 {dimension_numbers = #tpu.dot_dimension_numbers<[1], [0], [0], [1], [0, 0, 1, 1], [], []>} : vector<256x4xf32>, vector<4x8xf32>, vector<256x8xf32> -> vector<256x8xf32>
    %15 = arith.addf %9, %14 : vector<256x8xf32>
    %16 = vector.extract_strided_slice %2 {offsets = [0, 2, 0], sizes = [16, 16, 4], strides = [1, 1, 1]} : vector<18x18x4xf32> to vector<16x16x4xf32>
    %17 = vector.shape_cast %16 : vector<16x16x4xf32> to vector<256x4xf32>
    %c2 = arith.constant 2 : index
    %c0_10 = arith.constant 0 : index
    %c0_11 = arith.constant 0 : index
    %18 = vector.load %arg2[%c2, %c0_10, %c0_11] : memref<9x4x8xf32, #tpu.memory_space<vmem>>, vector<1x4x8xf32>
    %19 = vector.shape_cast %18 : vector<1x4x8xf32> to vector<4x8xf32>
    %cst_12 = arith.constant dense<0.000000e+00> : vector<256x8xf32>
    %20 = tpu.matmul %17, %19, %cst_12 {dimension_numbers = #tpu.dot_dimension_numbers<[1], [0], [0], [1], [0, 0, 1, 1], [], []>} : vector<256x4xf32>, vector<4x8xf32>, vector<256x8xf32> -> vector<256x8xf32>
    %21 = arith.addf %15, %20 : vector<256x8xf32>
    %22 = vector.extract_strided_slice %2 {offsets = [1, 0, 0], sizes = [16, 16, 4], strides = [1, 1, 1]} : vector<18x18x4xf32> to vector<16x16x4xf32>
    %23 = vector.shape_cast %22 : vector<16x16x4xf32> to vector<256x4xf32>
    %c3 = arith.constant 3 : index
    %c0_13 = arith.constant 0 : index
    %c0_14 = arith.constant 0 : index
    %24 = vector.load %arg2[%c3, %c0_13, %c0_14] : memref<9x4x8xf32, #tpu.memory_space<vmem>>, vector<1x4x8xf32>
    %25 = vector.shape_cast %24 : vector<1x4x8xf32> to vector<4x8xf32>
    %cst_15 = arith.constant dense<0.000000e+00> : vector<256x8xf32>
    %26 = tpu.matmul %23, %25, %cst_15 {dimension_numbers = #tpu.dot_dimension_numbers<[1], [0], [0], [1], [0, 0, 1, 1], [], []>} : vector<256x4xf32>, vector<4x8xf32>, vector<256x8xf32> -> vector<256x8xf32>
    %27 = arith.addf %21, %26 : vector<256x8xf32>
    %28 = vector.extract_strided_slice %2 {offsets = [1, 1, 0], sizes = [16, 16, 4], strides = [1, 1, 1]} : vector<18x18x4xf32> to vector<16x16x4xf32>
    %29 = vector.shape_cast %28 : vector<16x16x4xf32> to vector<256x4xf32>
    %c4 = arith.constant 4 : index
    %c0_16 = arith.constant 0 : index
    %c0_17 = arith.constant 0 : index
    %30 = vector.load %arg2[%c4, %c0_16, %c0_17] : memref<9x4x8xf32, #tpu.memory_space<vmem>>, vector<1x4x8xf32>
    %31 = vector.shape_cast %30 : vector<1x4x8xf32> to vector<4x8xf32>
    %cst_18 = arith.constant dense<0.000000e+00> : vector<256x8xf32>
    %32 = tpu.matmul %29, %31, %cst_18 {dimension_numbers = #tpu.dot_dimension_numbers<[1], [0], [0], [1], [0, 0, 1, 1], [], []>} : vector<256x4xf32>, vector<4x8xf32>, vector<256x8xf32> -> vector<256x8xf32>
    %33 = arith.addf %27, %32 : vector<256x8xf32>
    %34 = vector.extract_strided_slice %2 {offsets = [1, 2, 0], sizes = [16, 16, 4], strides = [1, 1, 1]} : vector<18x18x4xf32> to vector<16x16x4xf32>
    %35 = vector.shape_cast %34 : vector<16x16x4xf32> to vector<256x4xf32>
    %c5 = arith.constant 5 : index
    %c0_19 = arith.constant 0 : index
    %c0_20 = arith.constant 0 : index
    %36 = vector.load %arg2[%c5, %c0_19, %c0_20] : memref<9x4x8xf32, #tpu.memory_space<vmem>>, vector<1x4x8xf32>
    %37 = vector.shape_cast %36 : vector<1x4x8xf32> to vector<4x8xf32>
    %cst_21 = arith.constant dense<0.000000e+00> : vector<256x8xf32>
    %38 = tpu.matmul %35, %37, %cst_21 {dimension_numbers = #tpu.dot_dimension_numbers<[1], [0], [0], [1], [0, 0, 1, 1], [], []>} : vector<256x4xf32>, vector<4x8xf32>, vector<256x8xf32> -> vector<256x8xf32>
    %39 = arith.addf %33, %38 : vector<256x8xf32>
    %40 = vector.extract_strided_slice %2 {offsets = [2, 0, 0], sizes = [16, 16, 4], strides = [1, 1, 1]} : vector<18x18x4xf32> to vector<16x16x4xf32>
    %41 = vector.shape_cast %40 : vector<16x16x4xf32> to vector<256x4xf32>
    %c6 = arith.constant 6 : index
    %c0_22 = arith.constant 0 : index
    %c0_23 = arith.constant 0 : index
    %42 = vector.load %arg2[%c6, %c0_22, %c0_23] : memref<9x4x8xf32, #tpu.memory_space<vmem>>, vector<1x4x8xf32>
    %43 = vector.shape_cast %42 : vector<1x4x8xf32> to vector<4x8xf32>
    %cst_24 = arith.constant dense<0.000000e+00> : vector<256x8xf32>
    %44 = tpu.matmul %41, %43, %cst_24 {dimension_numbers = #tpu.dot_dimension_numbers<[1], [0], [0], [1], [0, 0, 1, 1], [], []>} : vector<256x4xf32>, vector<4x8xf32>, vector<256x8xf32> -> vector<256x8xf32>
    %45 = arith.addf %39, %44 : vector<256x8xf32>
    %46 = vector.extract_strided_slice %2 {offsets = [2, 1, 0], sizes = [16, 16, 4], strides = [1, 1, 1]} : vector<18x18x4xf32> to vector<16x16x4xf32>
    %47 = vector.shape_cast %46 : vector<16x16x4xf32> to vector<256x4xf32>
    %c7 = arith.constant 7 : index
    %c0_25 = arith.constant 0 : index
    %c0_26 = arith.constant 0 : index
    %48 = vector.load %arg2[%c7, %c0_25, %c0_26] : memref<9x4x8xf32, #tpu.memory_space<vmem>>, vector<1x4x8xf32>
    %49 = vector.shape_cast %48 : vector<1x4x8xf32> to vector<4x8xf32>
    %cst_27 = arith.constant dense<0.000000e+00> : vector<256x8xf32>
    %50 = tpu.matmul %47, %49, %cst_27 {dimension_numbers = #tpu.dot_dimension_numbers<[1], [0], [0], [1], [0, 0, 1, 1], [], []>} : vector<256x4xf32>, vector<4x8xf32>, vector<256x8xf32> -> vector<256x8xf32>
    %51 = arith.addf %45, %50 : vector<256x8xf32>
    %52 = vector.extract_strided_slice %2 {offsets = [2, 2, 0], sizes = [16, 16, 4], strides = [1, 1, 1]} : vector<18x18x4xf32> to vector<16x16x4xf32>
    %53 = vector.shape_cast %52 : vector<16x16x4xf32> to vector<256x4xf32>
    %c8 = arith.constant 8 : index
    %c0_28 = arith.constant 0 : index
    %c0_29 = arith.constant 0 : index
    %54 = vector.load %arg2[%c8, %c0_28, %c0_29] : memref<9x4x8xf32, #tpu.memory_space<vmem>>, vector<1x4x8xf32>
    %55 = vector.shape_cast %54 : vector<1x4x8xf32> to vector<4x8xf32>
    %cst_30 = arith.constant dense<0.000000e+00> : vector<256x8xf32>
    %56 = tpu.matmul %53, %55, %cst_30 {dimension_numbers = #tpu.dot_dimension_numbers<[1], [0], [0], [1], [0, 0, 1, 1], [], []>} : vector<256x4xf32>, vector<4x8xf32>, vector<256x8xf32> -> vector<256x8xf32>
    %57 = arith.addf %51, %56 : vector<256x8xf32>
    %c0_31 = arith.constant 0 : index
    %c0_32 = arith.constant 0 : index
    %58 = vector.load %arg3[%c0_31, %c0_32] : memref<1x8xf32, #tpu.memory_space<vmem>>, vector<1x8xf32>
    %59 = vector.broadcast %58 : vector<1x8xf32> to vector<256x8xf32>
    %60 = arith.addf %57, %59 : vector<256x8xf32>
    %cst_33 = arith.constant 0.000000e+00 : f32
    %61 = vector.broadcast %cst_33 : f32 to vector<256x8xf32>
    %62 = arith.cmpf ogt, %60, %61 : vector<256x8xf32>
    %cst_34 = arith.constant 1.000000e-01 : f32
    %63 = vector.broadcast %cst_34 : f32 to vector<256x8xf32>
    %64 = arith.mulf %63, %60 : vector<256x8xf32>
    %65 = arith.select %62, %60, %64 : vector<256x8xi1>, vector<256x8xf32>
    %c0_35 = arith.constant 0 : index
    %c0_36 = arith.constant 0 : index
    %c0_37 = arith.constant 0 : index
    %66 = vector.load %arg4[%c0_35, %c0_36, %c0_37] : memref<1x256x8xf32, #tpu.memory_space<vmem>>, vector<1x256x8xf32>
    %67 = vector.shape_cast %66 : vector<1x256x8xf32> to vector<256x8xf32>
    %68 = vector.shape_cast %65 : vector<256x8xf32> to vector<1x256x8xf32>
    tpu.vector_store %arg4[%c0_35, %c0_36, %c0_37], %68 {strides = array<i32>} : memref<1x256x8xf32, #tpu.memory_space<vmem>>, vector<1x256x8xf32>,
    return
  }
  func.func @transform_0(%arg0: i32) -> (i32, i32, i32, i32) {
    %c0_i32 = arith.constant 0 : i32
    %c0_i32_0 = arith.constant 0 : i32
    %c0_i32_1 = arith.constant 0 : i32
    %c0_i32_2 = arith.constant 0 : i32
    return %arg0, %c0_i32, %c0_i32_0, %c0_i32_1 : i32, i32, i32, i32
  }
  func.func @transform_1(%arg0: i32) -> (i32, i32, i32) {
    %c0_i32 = arith.constant 0 : i32
    %c0_i32_0 = arith.constant 0 : i32
    %c0_i32_1 = arith.constant 0 : i32
    %c0_i32_2 = arith.constant 0 : i32
    return %c0_i32, %c0_i32_0, %c0_i32_1 : i32, i32, i32
  }
  func.func @transform_2(%arg0: i32) -> (i32, i32) {
    %c0_i32 = arith.constant 0 : i32
    %c0_i32_0 = arith.constant 0 : i32
    %c0_i32_1 = arith.constant 0 : i32
    return %c0_i32, %c0_i32_0 : i32, i32
  }
  func.func @transform_3(%arg0: i32) -> (i32, i32, i32) {
    %c0_i32 = arith.constant 0 : i32
    %c0_i32_0 = arith.constant 0 : i32
    %c0_i32_1 = arith.constant 0 : i32
    return %arg0, %c0_i32, %c0_i32_0 : i32, i32, i32
  }
}

</mosaic_0001>

<bundles_post_ra>
// kernel: base_conv_forward.1
= control target key start
LH: loop header
LB: loop body
LE: loop exit
PB: predicated region body
PF: predicated region fallthrough
CT: control target
= control target key end

     0   :  { %s4396_s12 = smov 0   ;;  %s6131_s0 = inlined_call_operand.vmem [shape: bf16[2,18,18,4], index: 0, kind: input, shape index: {}]   ;;  %s6132_s1 = inlined_call_operand.vmem [shape: f32[9,4,8], index: 1, kind: input, shape index: {}]   ;;  %s6133_s2 = inlined_call_operand.vmem [shape: f32[1,8], index: 2, kind: input, shape index: {}]   ;;  %s6134_s3 = inlined_call_operand.vmem [shape: f32[2,256,8], index: 3, kind: output, shape index: {}]  }
   0x1 LB: > { %s3249_s13 = sadd.s32 4294967295, %s4374_s12   ;;  %p3253_p0 = scmp.ge.s32.totalorder %s4374_s12, 1  ;;  %s4374_s12 = sphi %s4396_s12, %s13_s12  }
   0x2   : > { %p137_p1 = scmp.lt.s32.totalorder %s4374_s12, 3 }
   0x4   : > { %p138_p2 = pnand %p3253_p0, %p137_p1 }
   0x6   : > { %141 = sbr.rel (%p138_p2) target bundleno = 516 (0x204), region = 32 }
   0xb   : > { %v3257_v0 = vld [vmem:[%s6132_s1 + $0x4] sm:$0xf]  ;;  %vm476_vm0 = vcmask 1043456   ;;  %p161_p3 = scmp.lt.s32.totalorder %s3249_s13, 1  ;;  %v279_v1 = vld [vmem:[%s6132_s1] sm:$0xf] }
   0xc   : > { %4357 = vmatprep.subr.msk.mxu1 %vm476_vm0, %v3257_v0  ;;  %3907 = vmatprep.subr.msk.mxu0 %vm476_vm0, %v3257_v0  ;;  %v3324_v2 = vld [vmem:[%s6132_s1 + $0x8] sm:$0xf]  ;;  %vm328_vm1 = vcmask 1046528   ;;  %vm411_vm2 = vcmask 31744   ;;  %v4491_v37 = vld [vmem:[%s6132_s1 + $0xc] sm:$0xf] }
   0xd   : > { %4358 = vmatpush3.msk.msra.mxu1 %vm476_vm0, %v3257_v0  ;;  %3908 = vmatpush3.msk.msra.mxu0 %vm476_vm0, %v3257_v0  ;;  %s6451_s13 = smov (!%p161_p3, %s3249_s13), 1  ;;  %v4506_v42 = vld [vmem:[%s6132_s1 + $0x10] sm:$0xf]  ;;  %vm997_vm3 = vcmask 1045504   ;;  %vm3161_vm4 = vcmask 64512  }
   0xe   : > { %3957 = vmatprep.subr.msk.mxu1 %vm476_vm0, %v279_v1  ;;  %4007 = vmatprep.subr.msk.mxu0 %vm476_vm0, %v3324_v2  ;;  %s4359_s20 = smul.u32 216, %s6451_s13  ;;  %s3565_s11 = sshll.u32 %s6451_s13, 8 }
   0xf   : > { %s5955_s16 = scalar_lea.vmem %s6134_s3, %s3565_s11 }
  0x10   : > { %s4425_s23 = scalar_lea.vmem %s6131_s0, %s4359_s20 }
  0x11   : > { %v3567_v3 = vld [vmem:[%s4425_s23] sm:$0xff]   ;;  %v4430_v5 = vld [vmem:[%s4425_s23 + $0x8] sm:$0x1]  ;;  %v174_v11 = vld [vmem:[%s4425_s23 + $0xc] sm:$0xff]  }
  0x12   : > { %v3605_v4 = vld [vmem:[%s4425_s23 + $0x60] sm:$0xff]   ;;  %v4432_v6 = vunpack.c.l.bf16 %v3567_v3  ;;  %v4434_v7 = vunpack.c.h.bf16 %v3567_v3  ;;  %v4441_v10 = vld [vmem:[%s4425_s23 + $0x68] sm:$0x1]  ;;  %v6142_v12 = vunpack.c.l.bf16 %v4430_v5  ;;  %v4446_v14 = vunpack.c.l.bf16 %v174_v11  ;;  %v198_v16 = vld [vmem:[%s4425_s23 + $0x6c] sm:$0xff]  }
  0x13   : > { %v4436_v8 = vunpack.c.l.bf16 %v3605_v4  ;;  %v4438_v9 = vunpack.c.h.bf16 %v3605_v4  ;;  %v6138_v13 = vunpack.c.l.bf16 %v4441_v10  ;;  %v4448_v15 = vunpack.c.h.bf16 %v174_v11  ;;  %v4456_v21 = vld [vmem:[%s4425_s23 + $0x14] sm:$0x1]  ;;  %v3602_v26 = vld [vmem:[%s4425_s23 + $0x18] sm:$0xff]   ;;  %v4486_v36 = vld [vmem:[%s4425_s23 + $0x20] sm:$0x1] }
  0x14   : > { %v329_v17 = vrot.slane %v4432_v6, 1  ;;  %v330_v18 = vrot.slane %v4434_v7, 1  ;;  %v332_v22 = vrot.slane %v6142_v12, 1  ;;  %v334_v24 = vrot.slane %v4446_v14, 1  ;;  %v4464_v25 = vld [vmem:[%s4425_s23 + $0x74] sm:$0x1] }
  0x15   : > { %v369_v19 = vrot.slane %v4436_v8, 1  ;;  %v370_v20 = vrot.slane %v4438_v9, 1  ;;  %v372_v23 = vrot.slane %v6138_v13, 1  ;;  %v335_v29 = vrot.slane %v4448_v15, 1  ;;  %v3606_v31 = vld [vmem:[%s4425_s23 + $0x78] sm:$0xff]   ;;  %v180_v52 = vld [vmem:[%s4425_s23 + $0x24] sm:$0xff]  }
  0x16   : > { %v331_v27 = vsel %vm328_vm1, %v329_v17, %v330_v18  ;;  %v4472_v30 = vunpack.c.l.bf16 %v198_v16  ;;  %v333_v32 = vsel %vm328_vm1, %v330_v18, %v332_v22  ;;  %v4482_v34 = vunpack.c.h.bf16 %v198_v16  ;;  %v4518_v47 = vld [vmem:[%s4425_s23 + $0x80] sm:$0x1]  ;;  %v204_v53 = vld [vmem:[%s4425_s23 + $0x84] sm:$0xff]   ;;  %v4554_v62 = vld [vmem:[%s4425_s23 + $0x2c] sm:$0x1] }
  0x17   : > { %v4469_v28 = vsel %vm328_vm1, %v369_v19, %v370_v20  ;;  %3909 = vmatprep.mubr.msk.f32.mxu0 %vm411_vm2, %v331_v27  ;;  %v4480_v33 = vsel %vm328_vm1, %v370_v20, %v372_v23  ;;  %v6141_v35 = vunpack.c.l.bf16 %v4456_v21  ;;  %v4497_v38 = vsel %vm328_vm1, %v334_v24, %v335_v29  ;;  %v4568_v3 = vld [vmem:[%s4425_s23 + $0x8c] sm:$0x1]  ;;  %v3603_v4 = vld [vmem:[%s4425_s23 + $0x30] sm:$0xff]  }
  0x18   : > { %6224 = vst [vmem:[#allocation2_spill] sm:$0xff] %v4469_v28  ;;  %3933 = vmatprep.mubr.msk.f32.mxu1 %vm411_vm2, %v4469_v28  ;;  %6225 = vst [vmem:[#allocation3_spill] sm:$0xff] %v4480_v33  ;;  %3910 = vmatmul.mubr.msk.f32.vlgmr.msra.gmra.mxu0 %vm411_vm2, %v333_v32  ;;  %v374_v39 = vrot.slane %v4472_v30, 1  ;;  %v6137_v40 = vunpack.c.l.bf16 %v4464_v25  ;;  %v4501_v41 = vunpack.c.l.bf16 %v3602_v26  ;;  %v375_v43 = vrot.slane %v4482_v34, 1  ;;  %v3607_v19 = vld [vmem:[%s4425_s23 + $0x90] sm:$0xff]  }
  0x19   : > { %3934 = vmatmul.mubr.msk.f32.vlgmr.msra.gmra.mxu1 %vm411_vm2, %v4480_v33  ;;  %6226 = vst [vmem:[#allocation4_spill] sm:$0xff] %v4497_v38  ;;  %4008 = vmatpush3.msk.msra.mxu0 %vm476_vm0, %v3324_v2  ;;  %v337_v44 = vrot.slane %v6141_v35, 1  ;;  %v4513_v45 = vunpack.c.h.bf16 %v3602_v26  ;;  %v4515_v46 = vunpack.c.l.bf16 %v3606_v31  ;;  %v4525_v50 = vunpack.c.h.bf16 %v3606_v31  ;;  %v4600_v32 = vld [vmem:[%s4425_s23 + $0x38] sm:$0x1] }
  0x1a   : > { %3958 = vmatpush3.msk.msra.mxu1 %vm476_vm0, %v279_v1  ;;  %3912 = vmatprep.mubr.msk.f32.mxu0 %vm411_vm2, %v4497_v38  ;;  %v377_v48 = vrot.slane %v6137_v40, 1  ;;  %v339_v49 = vrot.slane %v4501_v41, 1  ;;  %v6140_v51 = vunpack.c.l.bf16 %v4486_v36  ;;  %v4533_v54 = vsel %vm328_vm1, %v374_v39, %v375_v43 }
  0x1b   : > { %4057 = vmatprep.subr.msk.mxu1 %vm476_vm0, %v4491_v37  ;;  %6227 = vst [vmem:[#allocation5_spill] sm:$0xff] %v4533_v54  ;;  %v4536_v55 = vsel %vm328_vm1, %v335_v29, %v337_v44  ;;  %v340_v56 = vrot.slane %v4513_v45, 1  ;;  %v379_v57 = vrot.slane %v4515_v46, 1  ;;  %4107 = vmatprep.subr.msk.mxu0 %vm476_vm0, %v4506_v42  ;;  %v380_v59 = vrot.slane %v4525_v50, 1 }
  0x1c   : > { %6228 = vst [vmem:[#allocation6_spill] sm:$0xff] %v4536_v55  ;;  %3936 = vmatprep.mubr.msk.f32.mxu1 %vm411_vm2, %v4533_v54  ;;  %3913 = vmatmul.mubr.msk.f32.gmra.mxu0 %vm411_vm2, %v4536_v55  ;;  %v4547_v58 = vsel %vm328_vm1, %v375_v43, %v377_v48  ;;  %v342_v60 = vrot.slane %v6140_v51, 1  ;;  %v6136_v61 = vunpack.c.l.bf16 %v4518_v47  ;;  %v4561_v0 = vunpack.c.l.bf16 %v180_v52  ;;  %v3604_v51 = vld [vmem:[%s4425_s23 + $0x48] sm:$0xff]   ;;  %v192_v54 = vld [vmem:[%s4425_s23 + $0x54] sm:$0xff]  }
  0x1d   : > { %6229 = vst [vmem:[#allocation7_spill] sm:$0xff] %v4547_v58  ;;  %3937 = vmatmul.mubr.msk.f32.gmra.mxu1 %vm411_vm2, %v4547_v58  ;;  %v4559_v63 = vsel %vm328_vm1, %v339_v49, %v340_v56  ;;  %v4563_v1 = vunpack.c.h.bf16 %v180_v52  ;;  %v4565_v2 = vunpack.c.l.bf16 %v204_v53  ;;  %v4574_v11 = vsel %vm328_vm1, %v379_v57, %v380_v59  ;;  %v4614_v49 = vld [vmem:[%s4425_s23 + $0x98] sm:$0x1]  ;;  %v186_v52 = vld [vmem:[%s4425_s23 + $0x3c] sm:$0xff]  }
  0x1e   : > { %6230 = vst [vmem:[#allocation8_spill] sm:$0xff] %v4559_v63  ;;  %3915 = vmatprep.mubr.msk.f32.mxu0 %vm411_vm2, %v4559_v63  ;;  %6231 = vst [vmem:[#allocation9_spill] sm:$0xff] %v4574_v11  ;;  %v4577_v16 = vsel %vm328_vm1, %v340_v56, %v342_v60  ;;  %v382_v17 = vrot.slane %v6136_v61, 1  ;;  %v4581_v18 = vunpack.c.h.bf16 %v204_v53  ;;  %3939 = vmatprep.mubr.msk.f32.mxu1 %vm411_vm2, %v4574_v11  ;;  %v344_v20 = vrot.slane %v4561_v0, 1  ;;  %v210_v60 = vld [vmem:[%s4425_s23 + $0x9c] sm:$0xff]  }
  0x1f   : > { %6232 = vst [vmem:[#allocation10_spill] sm:$0xff] %v4577_v16  ;;  %v345_v22 = vrot.slane %v4563_v1, 1  ;;  %v384_v23 = vrot.slane %v4565_v2, 1  ;;  %v6139_v24 = vunpack.c.l.bf16 %v4554_v62  ;;  %v6135_v29 = vunpack.c.l.bf16 %v4568_v3 }
  0x20   : > { %3916 = vmatmul.mubr.msk.f32.gmra.mxu0 %vm411_vm2, %v4577_v16  ;;  %v4593_v26 = vsel %vm328_vm1, %v380_v59, %v382_v17  ;;  %v385_v27 = vrot.slane %v4581_v18, 1  ;;  %v4597_v31 = vunpack.c.l.bf16 %v3603_v4  ;;  %v4609_v44 = vunpack.c.h.bf16 %v3603_v4 }
  0x21   : > { %6233 = vst [vmem:[#allocation11_spill] sm:$0xff] %v4593_v26  ;;  %3940 = vmatmul.mubr.msk.f32.gmra.mxu1 %vm411_vm2, %v4593_v26  ;;  %v4605_v39 = vsel %vm328_vm1, %v344_v20, %v345_v22  ;;  %v347_v43 = vrot.slane %v6139_v24, 1  ;;  %v4611_v48 = vunpack.c.l.bf16 %v3607_v19  ;;  %v387_v56 = vrot.slane %v6135_v29, 1  ;;  %v4660_v24 = vld [vmem:[%s4425_s23 + $0xa4] sm:$0x1] }
  0x22   : > { %6234 = vst [vmem:[#allocation12_spill] sm:$0xff] %v4605_v39  ;;  %3918 = vmatprep.mubr.msk.f32.mxu0 %vm411_vm2, %v4605_v39  ;;  %v4620_v53 = vsel %vm328_vm1, %v384_v23, %v385_v27  ;;  %v349_v57 = vrot.slane %v4597_v31, 1  ;;  %v4625_v59 = vunpack.c.h.bf16 %v3607_v19  ;;  %v350_v17 = vrot.slane %v4609_v44, 1 }
  0x23   : > { %6235 = vst [vmem:[#allocation13_spill] sm:$0xff] %v4620_v53  ;;  %3942 = vmatprep.mubr.msk.f32.mxu1 %vm411_vm2, %v4620_v53  ;;  %v4631_v4 = vsel %vm328_vm1, %v345_v22, %v347_v43  ;;  %v389_v20 = vrot.slane %v4611_v48, 1  ;;  %v6143_v23 = vunpack.c.l.bf16 %v4600_v32  ;;  %v4639_v19 = vsel %vm328_vm1, %v385_v27, %v387_v56  ;;  %v4646_v43 = vld [vmem:[%s4425_s23 + $0x44] sm:$0x1] }
  0x24   : > { %6236 = vst [vmem:[#allocation14_spill] sm:$0xff] %v4631_v4  ;;  %3919 = vmatmul.mubr.msk.f32.gmra.mxu0 %vm411_vm2, %v4631_v4  ;;  %6237 = vst [vmem:[#allocation15_spill] sm:$0xff] %v4639_v19  ;;  %v390_v29 = vrot.slane %v4625_v59, 1  ;;  %v6150_v61 = vunpack.c.l.bf16 %v4614_v49  ;;  %v4643_v22 = vunpack.c.l.bf16 %v186_v52  ;;  %v4651_v40 = vsel %vm328_vm1, %v349_v57, %v350_v17 }
  0x25   : > { %3943 = vmatmul.mubr.msk.f32.gmra.mxu1 %vm411_vm2, %v4639_v19  ;;  %6238 = vst [vmem:[#allocation16_spill] sm:$0xff] %v4651_v40  ;;  %v352_v13 = vrot.slane %v6143_v23, 1  ;;  %v4655_v27 = vunpack.c.h.bf16 %v186_v52  ;;  %v4657_v56 = vunpack.c.l.bf16 %v210_v60  ;;  %3921 = vmatprep.mubr.msk.f32.mxu0 %vm411_vm2, %v4651_v40  ;;  %v4671_v23 = vunpack.c.h.bf16 %v210_v60  ;;  %v3608_v52 = vld [vmem:[%s4425_s23 + $0xa8] sm:$0xff]  }
  0x26   : > { %v4666_v35 = vsel %vm328_vm1, %v389_v20, %v390_v29  ;;  %v392_v57 = vrot.slane %v6150_v61, 1  ;;  %v354_v12 = vrot.slane %v4643_v22, 1  ;;  %v6243_v11 = vunpack.c.l.bf16 %v4646_v43 }
  0x27   : > { %6239 = vst [vmem:[#allocation17_spill] sm:$0xff] %v4666_v35  ;;  %3945 = vmatprep.mubr.msk.f32.mxu1 %vm411_vm2, %v4666_v35  ;;  %v4677_v19 = vsel %vm328_vm1, %v350_v17, %v352_v13  ;;  %v355_v53 = vrot.slane %v4655_v27, 1  ;;  %v394_v20 = vrot.slane %v4657_v56, 1  ;;  %v395_v61 = vrot.slane %v4671_v23, 1  ;;  %v4692_v17 = vld [vmem:[%s4425_s23 + $0x50] sm:$0x1] }
  0x28   : > { %6240 = vst [vmem:[#allocation18_spill] sm:$0xff] %v4677_v19  ;;  %3922 = vmatmul.mubr.msk.f32.gmra.mxu0 %vm411_vm2, %v4677_v19  ;;  %v4685_v60 = vsel %vm328_vm1, %v390_v29, %v392_v57  ;;  %v4689_v13 = vunpack.c.l.bf16 %v3604_v51  ;;  %v357_v29 = vrot.slane %v6243_v11, 1  ;;  %v4701_v57 = vunpack.c.h.bf16 %v3604_v51  ;;  %v4706_v35 = vld [vmem:[%s4425_s23 + $0xb0] sm:$0x1]  ;;  %v216_v51 = vld [vmem:[%s4425_s23 + $0xb4] sm:$0xff]  }
  0x29   : > { %6241 = vst [vmem:[#allocation19_spill] sm:$0xff] %v4685_v60  ;;  %3946 = vmatmul.mubr.msk.f32.gmra.mxu1 %vm411_vm2, %v4685_v60  ;;  %v4697_v26 = vsel %vm328_vm1, %v354_v12, %v355_v53  ;;  %v4703_v58 = vunpack.c.l.bf16 %v3608_v52  ;;  %v4712_v33 = vsel %vm328_vm1, %v394_v20, %v395_v61  ;;  %v6245_v12 = vunpack.c.l.bf16 %v4660_v24 }
  0x2a   : > { %6242 = vst [vmem:[#allocation20_spill] sm:$0xff] %v4697_v26  ;;  %3924 = vmatprep.mubr.msk.f32.mxu0 %vm411_vm2, %v4697_v26  ;;  %6244 = vst [vmem:[#allocation21_spill] sm:$0xff] %v4712_v33  ;;  %v359_v28 = vrot.slane %v4689_v13, 1  ;;  %v4717_v11 = vunpack.c.h.bf16 %v3608_v52  ;;  %3948 = vmatprep.mubr.msk.f32.mxu1 %vm411_vm2, %v4712_v33  ;;  %v4723_v19 = vsel %vm328_vm1, %v355_v53, %v357_v29  ;;  %v360_v26 = vrot.slane %v4701_v57, 1  ;;  %v4738_v53 = vld [vmem:[%s4425_s23 + $0x5c] sm:$0x1] }
  0x2b   : > { %v397_v60 = vrot.slane %v6245_v12, 1  ;;  %6246 = vst [vmem:[#allocation22_spill] sm:$0xff] %v4723_v19  ;;  %v399_v20 = vrot.slane %v4703_v58, 1  ;;  %v6185_v40 = vunpack.c.l.bf16 %v4692_v17  ;;  %v4735_v4 = vunpack.c.l.bf16 %v192_v54 }
  0x2c   : > { %3925 = vmatmul.mubr.msk.f32.gmra.mxu0 %vm411_vm2, %v4723_v19  ;;  %v400_v12 = vrot.slane %v4717_v11, 1  ;;  %v4743_v29 = vsel %vm328_vm1, %v359_v28, %v360_v26  ;;  %v4747_v39 = vunpack.c.h.bf16 %v192_v54  ;;  %v4762_v63 = vunpack.c.h.bf16 %v216_v51 }
  0x2d   : > { %v4731_v52 = vsel %vm328_vm1, %v395_v61, %v397_v60  ;;  %6248 = vst [vmem:[#allocation24_spill] sm:$0xff] %v4743_v29  ;;  %v362_v19 = vrot.slane %v6185_v40, 1  ;;  %v4749_v61 = vunpack.c.l.bf16 %v216_v51  ;;  %v4752_v60 = vld [vmem:[%s4425_s23 + $0xbc] sm:$0x1]  ;;  %3927 = vmatprep.mubr.msk.f32.mxu0 %vm411_vm2, %v4743_v29  ;;  %v364_v28 = vrot.slane %v4735_v4, 1 }
  0x2e   : > { %6247 = vst [vmem:[#allocation23_spill] sm:$0xff] %v4731_v52  ;;  %3949 = vmatmul.mubr.msk.f32.gmra.mxu1 %vm411_vm2, %v4731_v52  ;;  %v4757_v33 = vsel %vm328_vm1, %v399_v20, %v400_v12  ;;  %v6250_v52 = vunpack.c.l.bf16 %v4706_v35  ;;  %v365_v40 = vrot.slane %v4747_v39, 1  ;;  %v405_v51 = vrot.slane %v4762_v63, 1 }
  0x2f   : > { %6249 = vst [vmem:[#allocation25_spill] sm:$0xff] %v4757_v33  ;;  %3951 = vmatprep.mubr.msk.f32.mxu1 %vm411_vm2, %v4757_v33  ;;  %v4767_v54 = vsel %vm328_vm1, %v360_v26, %v362_v19  ;;  %v404_v29 = vrot.slane %v4749_v61, 1  ;;  %v6196_v55 = vunpack.c.l.bf16 %v4752_v60  ;;  %v998_v33 = vrot.slane %v4432_v6, 2 }
  0x30   : > { %v402_v16 = vrot.slane %v6250_v52, 1  ;;  %6251 = vst [vmem:[#allocation26_spill] sm:$0xff] %v4767_v54  ;;  %3928 = vmatmul.mubr.msk.f32.gmra.mxu0 %vm411_vm2, %v4767_v54  ;;  %v6253_v26 = vunpack.c.l.bf16 %v4430_v5  ;;  %v4785_v20 = vsel %vm328_vm1, %v364_v28, %v365_v40  ;;  %v6255_v54 = vunpack.c.l.bf16 %v4738_v53 }
  0x31   : > { %6254 = vst [vmem:[#allocation28_spill] sm:$0xff] %v4785_v20  ;;  %3930 = vmatprep.mubr.msk.f32.mxu0 %vm411_vm2, %v4785_v20  ;;  %v407_v5 = vrot.slane %v6196_v55, 1 }
  0x32   : > { %v4775_v52 = vsel %vm328_vm1, %v400_v12, %v402_v16  ;;  %v1001_v19 = vrot.slane %v6253_v26, 2  ;;  %v367_v38 = vrot.slane %v6255_v54, 1  ;;  %v999_v16 = vrot.slane %v4434_v7, 2 }
  0x33   : > { %6252 = vst [vmem:[#allocation27_spill] sm:$0xff] %v4775_v52  ;;  %3952 = vmatmul.mubr.msk.f32.gmra.mxu1 %vm411_vm2, %v4775_v52  ;;  %v4793_v12 = vsel %vm328_vm1, %v404_v29, %v405_v51  ;;  %v4806_v54 = vsel %vm328_vm1, %v405_v51, %v407_v5  ;;  %v1003_v29 = vrot.slane %v4446_v14, 2  ;;  %v1004_v52 = vrot.slane %v4448_v15, 2 }
  0x34   : > { %6256 = vst [vmem:[#allocation29_spill] sm:$0xff] %v4793_v12  ;;  %3954 = vmatprep.mubr.msk.f32.mxu1 %vm411_vm2, %v4793_v12  ;;  %v4800_v28 = vsel %vm328_vm1, %v365_v40, %v367_v38  ;;  %v1000_v26 = vsel %vm997_vm3, %v998_v33, %v999_v16  ;;  %6258 = vst [vmem:[#allocation31_spill] sm:$0xff] %v4806_v54  ;;  %v1002_v38 = vsel %vm997_vm3, %v999_v16, %v1001_v19  ;;  %v4841_v16 = vld [vmem:[%s6132_s1 + $0x18] sm:$0xf] }
  0x35   : > { %6257 = vst [vmem:[#allocation30_spill] sm:$0xff] %v4800_v28  ;;  %3931 = vmatmul.mubr.msk.f32.gmra.mxu0 %vm411_vm2, %v4800_v28  ;;  %v6259_v40 = vunpack.c.l.bf16 %v4456_v21  ;;  %v1008_v51 = vrot.slane %v4501_v41, 2  ;;  %v1009_v5 = vrot.slane %v4513_v45, 2  ;;  %v4822_v55 = vsel %vm997_vm3, %v1003_v29, %v1004_v52 }
  0x36   : > { %4009 = vmatprep.mubr.msk.f32.mxu0 %vm411_vm2, %v1000_v26  ;;  %v4827_v26 = vld [vmem:[%s6132_s1 + $0x14] sm:$0xf]  ;;  %v6260_v21 = vunpack.c.l.bf16 %v4486_v36 }
  0x37   : > { %3955 = vmatmul.mubr.msk.f32.gmra.mxu1 %vm411_vm2, %v4806_v54  ;;  %v1006_v33 = vrot.slane %v6259_v40, 2  ;;  %v1018_v40 = vrot.slane %v4597_v31, 2 }
  0x38   : > { %3959 = vmatprep.mubr.msk.f32.mxu1 %vm411_vm2, %v4432_v6  ;;  %v1011_v19 = vrot.slane %v6260_v21, 2 }
  0x39   : > { %4010 = vmatmul.mubr.msk.f32.vlgmr.msra.gmra.mxu0 %vm411_vm2, %v1002_v38  ;;  %v4834_v6 = vsel %vm997_vm3, %v1004_v52, %v1006_v33  ;;  %v1014_v52 = vrot.slane %v4563_v1, 2  ;;  %v1019_v33 = vrot.slane %v4609_v44, 2 }
  0x3a   : > { %4108 = vmatpush3.msk.msra.mxu0 %vm476_vm0, %v4506_v42  ;;  %v1013_v42 = vrot.slane %v4561_v0, 2  ;;  %4012 = vmatprep.mubr.msk.f32.mxu0 %vm411_vm2, %v4822_v55  ;;  %v4865_v36 = vsel %vm997_vm3, %v1009_v5, %v1011_v19  ;;  %v1023_v19 = vrot.slane %v4643_v22, 2 }
  0x3b   : > { %3960 = vmatmul.mubr.msk.f32.vlgmr.msra.gmra.mxu1 %vm411_vm2, %v4434_v7  ;;  %v4848_v7 = vsel %vm997_vm3, %v1008_v51, %v1009_v5  ;;  %4207 = vmatprep.subr.msk.mxu0 %vm476_vm0, %v4841_v16  ;;  %v6262_v51 = vunpack.c.l.bf16 %v4600_v32  ;;  %v4890_v21 = vsel %vm997_vm3, %v1018_v40, %v1019_v33  ;;  %v1028_v40 = vrot.slane %v4689_v13, 2 }
  0x3c   : > { %4058 = vmatpush3.msk.msra.mxu1 %vm476_vm0, %v4491_v37  ;;  %3962 = vmatprep.mubr.msk.f32.mxu1 %vm411_vm2, %v4446_v14  ;;  %v6261_v37 = vunpack.c.l.bf16 %v4554_v62  ;;  %v4872_v38 = vsel %vm997_vm3, %v1013_v42, %v1014_v52  ;;  %v1024_v42 = vrot.slane %v4655_v27, 2 }
  0x3d   : > { %4157 = vmatprep.subr.msk.mxu1 %vm476_vm0, %v4827_v26  ;;  %4013 = vmatmul.mubr.msk.f32.gmra.mxu0 %vm411_vm2, %v4834_v6  ;;  %v1021_v5 = vrot.slane %v6262_v51, 2  ;;  %v1029_v51 = vrot.slane %v4701_v57, 2 }
  0x3e   : > { %4015 = vmatprep.mubr.msk.f32.mxu0 %vm411_vm2, %v4848_v7  ;;  %v1016_v29 = vrot.slane %v6261_v37, 2 }
  0x3f   : > { %3963 = vmatmul.mubr.msk.f32.gmra.mxu1 %vm411_vm2, %v4448_v15  ;;  %v4901_v32 = vsel %vm997_vm3, %v1019_v33, %v1021_v5  ;;  %v6266_v33 = vunpack.c.l.bf16 %v4692_v17 }
  0x40   : > { %3965 = vmatprep.mubr.msk.f32.mxu1 %vm411_vm2, %v4501_v41  ;;  %v4883_v62 = vsel %vm997_vm3, %v1014_v52, %v1016_v29  ;;  %6263 = vst [vmem:[#allocation32_spill] sm:$0xff] %v4901_v32  ;;  %v6264_v52 = vunpack.c.l.bf16 %v4646_v43  ;;  %v4908_v29 = vsel %vm997_vm3, %v1023_v19, %v1024_v42  ;;  %v4926_v19 = vsel %vm997_vm3, %v1028_v40, %v1029_v51 }
  0x41   : > { %4016 = vmatmul.mubr.msk.f32.gmra.mxu0 %vm411_vm2, %v4865_v36  ;;  %v1031_v5 = vrot.slane %v6266_v33, 2  ;;  %v1038_v33 = vrot.slane %v4436_v8, 2 }
  0x42   : > { %4018 = vmatprep.mubr.msk.f32.mxu0 %vm411_vm2, %v4872_v38  ;;  %v1026_v37 = vrot.slane %v6264_v52, 2  ;;  %v1033_v52 = vrot.slane %v4735_v4, 2 }
  0x43   : > { %3966 = vmatmul.mubr.msk.f32.gmra.mxu1 %vm411_vm2, %v4513_v45  ;;  %v4937_v17 = vsel %vm997_vm3, %v1029_v51, %v1031_v5  ;;  %v6270_v51 = vunpack.c.l.bf16 %v4441_v10 }
  0x44   : > { %3968 = vmatprep.mubr.msk.f32.mxu1 %vm411_vm2, %v4561_v0  ;;  %v4919_v43 = vsel %vm997_vm3, %v1024_v42, %v1026_v37  ;;  %6267 = vst [vmem:[#allocation34_spill] sm:$0xff] %v4937_v17  ;;  %v6268_v42 = vunpack.c.l.bf16 %v4738_v53 }
  0x45   : > { %4019 = vmatmul.mubr.msk.f32.gmra.mxu0 %vm411_vm2, %v4883_v62  ;;  %6265 = vst [vmem:[#allocation33_spill] sm:$0xff] %v4919_v43  ;;  %v1041_v5 = vrot.slane %v6270_v51, 2  ;;  %v1048_v51 = vrot.slane %v4515_v46, 2 }
  0x46   : > { %4021 = vmatprep.mubr.msk.f32.mxu0 %vm411_vm2, %v4890_v21  ;;  %v1036_v37 = vrot.slane %v6268_v42, 2  ;;  %v1043_v42 = vrot.slane %v4472_v30, 2 }
  0x47   : > { %3969 = vmatmul.mubr.msk.f32.gmra.mxu1 %vm411_vm2, %v4563_v1 }
  0x48   : > { %3971 = vmatprep.mubr.msk.f32.mxu1 %vm411_vm2, %v4597_v31 }
  0x49   : > { %4022 = vmatmul.mubr.msk.f32.gmra.mxu0 %vm411_vm2, %v4901_v32  ;;  %v1034_v32 = vrot.slane %v4747_v39, 2 }
  0x4a   : > { %4024 = vmatprep.mubr.msk.f32.mxu0 %vm411_vm2, %v4908_v29 }
  0x4b   : > { %3972 = vmatmul.mubr.msk.f32.gmra.mxu1 %vm411_vm2, %v4609_v44  ;;  %v4944_v40 = vsel %vm997_vm3, %v1033_v52, %v1034_v32  ;;  %v4955_v53 = vsel %vm997_vm3, %v1034_v32, %v1036_v37  ;;  %v6272_v32 = vunpack.c.l.bf16 %v4464_v25 }
  0x4c   : > { %3974 = vmatprep.mubr.msk.f32.mxu1 %vm411_vm2, %v4643_v22  ;;  %6269 = vst [vmem:[#allocation35_spill] sm:$0xff] %v4955_v53 }
  0x4d   : > { %4025 = vmatmul.mubr.msk.f32.gmra.mxu0 %vm411_vm2, %v4919_v43  ;;  %v1039_v43 = vrot.slane %v4438_v9, 2  ;;  %v1046_v37 = vrot.slane %v6272_v32, 2  ;;  %v1053_v32 = vrot.slane %v4565_v2, 2 }
  0x4e   : > { %4027 = vmatprep.mubr.msk.f32.mxu0 %vm411_vm2, %v4926_v19 }
  0x4f   : > { %3975 = vmatmul.mubr.msk.f32.gmra.mxu1 %vm411_vm2, %v4655_v27  ;;  %v4962_v52 = vsel %vm997_vm3, %v1038_v33, %v1039_v43  ;;  %v4973_v10 = vsel %vm997_vm3, %v1039_v43, %v1041_v5  ;;  %v6274_v43 = vunpack.c.l.bf16 %v4518_v47 }
  0x50   : > { %3977 = vmatprep.mubr.msk.f32.mxu1 %vm411_vm2, %v4689_v13  ;;  %6271 = vst [vmem:[#allocation36_spill] sm:$0xff] %v4973_v10 }
  0x51   : > { %4028 = vmatmul.mubr.msk.f32.gmra.mxu0 %vm411_vm2, %v4937_v17  ;;  %v1044_v17 = vrot.slane %v4482_v34, 2  ;;  %v1051_v5 = vrot.slane %v6274_v43, 2  ;;  %v1058_v43 = vrot.slane %v4611_v48, 2 }
  0x52   : > { %4030 = vmatprep.mubr.msk.f32.mxu0 %vm411_vm2, %v4944_v40 }
  0x53   : > { %3978 = vmatmul.mubr.msk.f32.gmra.mxu1 %vm411_vm2, %v4701_v57  ;;  %v4980_v33 = vsel %vm997_vm3, %v1043_v42, %v1044_v17  ;;  %v4991_v25 = vsel %vm997_vm3, %v1044_v17, %v1046_v37  ;;  %v6276_v17 = vunpack.c.l.bf16 %v4568_v3 }
  0x54   : > { %3980 = vmatprep.mubr.msk.f32.mxu1 %vm411_vm2, %v4735_v4  ;;  %6273 = vst [vmem:[#allocation37_spill] sm:$0xff] %v4991_v25 }
  0x55   : > { %4031 = vmatmul.mubr.msk.f32.gmra.mxu0 %vm411_vm2, %v4955_v53  ;;  %v1049_v53 = vrot.slane %v4525_v50, 2  ;;  %v1056_v37 = vrot.slane %v6276_v17, 2  ;;  %v1063_v17 = vrot.slane %v4657_v56, 2 }
  0x56   : > { %4033 = vmatprep.mubr.msk.f32.mxu0 %vm411_vm2, %v4962_v52 }
  0x57   : > { %3981 = vmatmul.mubr.msk.f32.gmra.mxu1 %vm411_vm2, %v4747_v39  ;;  %v4998_v42 = vsel %vm997_vm3, %v1048_v51, %v1049_v53  ;;  %v5009_v47 = vsel %vm997_vm3, %v1049_v53, %v1051_v5  ;;  %v6278_v53 = vunpack.c.l.bf16 %v4614_v49 }
  0x58   : > { %3983 = vmatprep.mubr.msk.f32.mxu1 %vm411_vm2, %v4436_v8  ;;  %6275 = vst [vmem:[#allocation38_spill] sm:$0xff] %v5009_v47 }
  0x59   : > { %4034 = vmatmul.mubr.msk.f32.gmra.mxu0 %vm411_vm2, %v4973_v10  ;;  %v1054_v10 = vrot.slane %v4581_v18, 2  ;;  %v1061_v5 = vrot.slane %v6278_v53, 2  ;;  %v1068_v53 = vrot.slane %v4703_v58, 2 }
  0x5a   : > { %4036 = vmatprep.mubr.msk.f32.mxu0 %vm411_vm2, %v4980_v33 }
  0x5b   : > { %3984 = vmatmul.mubr.msk.f32.gmra.mxu1 %vm411_vm2, %v4438_v9  ;;  %v5016_v51 = vsel %vm997_vm3, %v1053_v32, %v1054_v10  ;;  %v5027_v3 = vsel %vm997_vm3, %v1054_v10, %v1056_v37  ;;  %v6280_v10 = vunpack.c.l.bf16 %v4660_v24 }
  0x5c   : > { %3986 = vmatprep.mubr.msk.f32.mxu1 %vm411_vm2, %v4472_v30  ;;  %6277 = vst [vmem:[#allocation39_spill] sm:$0xff] %v5027_v3 }
  0x5d   : > { %4037 = vmatmul.mubr.msk.f32.gmra.mxu0 %vm411_vm2, %v4991_v25  ;;  %v1059_v25 = vrot.slane %v4625_v59, 2  ;;  %v1066_v37 = vrot.slane %v6280_v10, 2  ;;  %v1073_v10 = vrot.slane %v4749_v61, 2 }
  0x5e   : > { %4039 = vmatprep.mubr.msk.f32.mxu0 %vm411_vm2, %v4998_v42 }
  0x5f   : > { %3987 = vmatmul.mubr.msk.f32.gmra.mxu1 %vm411_vm2, %v4482_v34  ;;  %v5034_v32 = vsel %vm997_vm3, %v1058_v43, %v1059_v25  ;;  %v5045_v49 = vsel %vm997_vm3, %v1059_v25, %v1061_v5  ;;  %v6281_v25 = vunpack.c.l.bf16 %v4706_v35 }
  0x60   : > { %3989 = vmatprep.mubr.msk.f32.mxu1 %vm411_vm2, %v4515_v46  ;;  %6279 = vst [vmem:[#allocation40_spill] sm:$0xff] %v5045_v49 }
  0x61   : > { %4040 = vmatmul.mubr.msk.f32.gmra.mxu0 %vm411_vm2, %v5009_v47  ;;  %v1064_v47 = vrot.slane %v4671_v23, 2  ;;  %v1071_v5 = vrot.slane %v6281_v25, 2  ;;  %v6284_v25 = vld [vmem:[#allocation6_spill] sm:$0xff] }
  0x62   : > { %4042 = vmatprep.mubr.msk.f32.mxu0 %vm411_vm2, %v5016_v51 }
  0x63   : > { %3990 = vmatmul.mubr.msk.f32.gmra.mxu1 %vm411_vm2, %v4525_v50  ;;  %v5052_v43 = vsel %vm997_vm3, %v1063_v17, %v1064_v47  ;;  %v5063_v24 = vsel %vm997_vm3, %v1064_v47, %v1066_v37  ;;  %v6282_v47 = vunpack.c.l.bf16 %v4752_v60  ;;  %v6283_v60 = vld [vmem:[#allocation4_spill] sm:$0xff] }
  0x64   : > { %3992 = vmatprep.mubr.msk.f32.mxu1 %vm411_vm2, %v4565_v2 }
  0x65   : > { %4043 = vmatmul.mubr.msk.f32.gmra.mxu0 %vm411_vm2, %v5027_v3  ;;  %v1069_v3 = vrot.slane %v4717_v11, 2  ;;  %v1076_v37 = vrot.slane %v6282_v47, 2  ;;  %v6290_v47 = vld [vmem:[#allocation18_spill] sm:$0xff] }
  0x66   : > { %4045 = vmatprep.mubr.msk.f32.mxu0 %vm411_vm2, %v5034_v32 }
  0x67   : > { %3993 = vmatmul.mubr.msk.f32.gmra.mxu1 %vm411_vm2, %v4581_v18  ;;  %v5070_v17 = vsel %vm997_vm3, %v1068_v53, %v1069_v3  ;;  %v5081_v35 = vsel %vm997_vm3, %v1069_v3, %v1071_v5  ;;  %v5123_v5 = vld [vmem:[%s6132_s1 + $0x20] sm:$0xf] }
  0x68   : > { %3995 = vmatprep.mubr.msk.f32.mxu1 %vm411_vm2, %v4611_v48 }
  0x69   : > { %4046 = vmatmul.mubr.msk.f32.gmra.mxu0 %vm411_vm2, %v5045_v49  ;;  %v1074_v49 = vrot.slane %v4762_v63, 2 }
  0x6a   : > { %4048 = vmatprep.mubr.msk.f32.mxu0 %vm411_vm2, %v5052_v43 }
  0x6b   : > { %3996 = vmatmul.mubr.msk.f32.gmra.mxu1 %vm411_vm2, %v4625_v59  ;;  %v5088_v53 = vsel %vm997_vm3, %v1073_v10, %v1074_v49  ;;  %v5097_v3 = vsel %vm997_vm3, %v1074_v49, %v1076_v37  ;;  %v5114_v49 = vld [vmem:[%s6132_s1 + $0x1c] sm:$0xf]  ;;  %v6289_v10 = vld [vmem:[#allocation16_spill] sm:$0xff] }
  0x6c   : > { %3998 = vmatprep.mubr.msk.f32.mxu1 %vm411_vm2, %v4657_v56  ;;  %v6291_v37 = vld [vmem:[#allocation20_spill] sm:$0xff] }
  0x6d   : > { %4049 = vmatmul.mubr.msk.f32.gmra.mxu0 %vm411_vm2, %v5063_v24 }
  0x6e   : > { %4051 = vmatprep.mubr.msk.f32.mxu0 %vm411_vm2, %v5070_v17 }
  0x6f   : > { %3999 = vmatmul.mubr.msk.f32.gmra.mxu1 %vm411_vm2, %v4671_v23 }
  0x70   : > { %4001 = vmatprep.mubr.msk.f32.mxu1 %vm411_vm2, %v4703_v58 }
  0x71   : > { %4052 = vmatmul.mubr.msk.f32.gmra.mxu0 %vm411_vm2, %v5081_v35 }
  0x72   : > { %4054 = vmatprep.mubr.msk.f32.mxu0 %vm411_vm2, %v5088_v53 }
  0x73   : > { %4002 = vmatmul.mubr.msk.f32.gmra.mxu1 %vm411_vm2, %v4717_v11 }
  0x74   : > { %4004 = vmatprep.mubr.msk.f32.mxu1 %vm411_vm2, %v4749_v61 }
  0x75   : > { %4055 = vmatmul.mubr.msk.f32.gmra.mxu0 %vm411_vm2, %v5097_v3 }
  0x76   : > { %4109 = vmatprep.mubr.msk.f32.mxu0 %vm411_vm2, %v6283_v60  ;;  %v6292_v60 = vld [vmem:[#allocation22_spill] sm:$0xff] }
  0x77   : > { %4005 = vmatmul.mubr.msk.f32.gmra.mxu1 %vm411_vm2, %v4762_v63 }
  0x78   : > { %4059 = vmatprep.mubr.msk.f32.mxu1 %vm411_vm2, %v4446_v14  ;;  %v6285_v14 = vld [vmem:[#allocation8_spill] sm:$0xff] }
  0x79   : > { %4110 = vmatmul.mubr.msk.f32.vlgmr.msra.gmra.mxu0 %vm411_vm2, %v6284_v25  ;;  %v6293_v25 = vld [vmem:[#allocation24_spill] sm:$0xff] }
  0x7a   : > { %4208 = vmatpush3.msk.msra.mxu0 %vm476_vm0, %v4841_v16  ;;  %4112 = vmatprep.mubr.msk.f32.mxu0 %vm411_vm2, %v6285_v14  ;;  %v6287_v16 = vld [vmem:[#allocation12_spill] sm:$0xff] }
  0x7b   : > { %4060 = vmatmul.mubr.msk.f32.vlgmr.msra.gmra.mxu1 %vm411_vm2, %v4448_v15  ;;  %v6286_v15 = vld [vmem:[#allocation10_spill] sm:$0xff]  ;;  %4307 = vmatprep.subr.msk.mxu0 %vm476_vm0, %v5123_v5 }
  0x7c   : > { %4158 = vmatpush3.msk.msra.mxu1 %vm476_vm0, %v4827_v26  ;;  %4062 = vmatprep.mubr.msk.f32.mxu1 %vm411_vm2, %v4501_v41  ;;  %v6288_v26 = vld [vmem:[#allocation14_spill] sm:$0xff] }
  0x7d   : > { %4257 = vmatprep.subr.msk.mxu1 %vm476_vm0, %v5114_v49  ;;  %4113 = vmatmul.mubr.msk.f32.gmra.mxu0 %vm411_vm2, %v6286_v15 }
  0x7e   : > { %4115 = vmatprep.mubr.msk.f32.mxu0 %vm411_vm2, %v6287_v16  ;;  %v6308_v16 = vld [vmem:[#allocation27_spill] sm:$0xff] }
  0x7f   : > { %4063 = vmatmul.mubr.msk.f32.gmra.mxu1 %vm411_vm2, %v4513_v45 }
  0x80   : > { %4065 = vmatprep.mubr.msk.f32.mxu1 %vm411_vm2, %v4561_v0 }
  0x81   : > { %4116 = vmatmul.mubr.msk.f32.gmra.mxu0 %vm411_vm2, %v6288_v26 }
  0x82   : > { %4118 = vmatprep.mubr.msk.f32.mxu0 %vm411_vm2, %v6289_v10  ;;  %v6306_v10 = vld [vmem:[#allocation23_spill] sm:$0xff] }
  0x83   : > { %4066 = vmatmul.mubr.msk.f32.gmra.mxu1 %vm411_vm2, %v4563_v1 }
  0x84   : > { %4068 = vmatprep.mubr.msk.f32.mxu1 %vm411_vm2, %v4597_v31 }
  0x85   : > { %4119 = vmatmul.mubr.msk.f32.gmra.mxu0 %vm411_vm2, %v6290_v47  ;;  %v6294_v47 = vld [vmem:[#allocation26_spill] sm:$0xff] }
  0x86   : > { %4121 = vmatprep.mubr.msk.f32.mxu0 %vm411_vm2, %v6291_v37 }
  0x87   : > { %4069 = vmatmul.mubr.msk.f32.gmra.mxu1 %vm411_vm2, %v4609_v44 }
  0x88   : > { %4071 = vmatprep.mubr.msk.f32.mxu1 %vm411_vm2, %v4643_v22 }
  0x89   : > { %4122 = vmatmul.mubr.msk.f32.gmra.mxu0 %vm411_vm2, %v6292_v60  ;;  %v6304_v60 = vld [vmem:[#allocation19_spill] sm:$0xff] }
  0x8a   : > { %4124 = vmatprep.mubr.msk.f32.mxu0 %vm411_vm2, %v6293_v25  ;;  %v6295_v25 = vld [vmem:[#allocation2_spill] sm:$0xff] }
  0x8b   : > { %4072 = vmatmul.mubr.msk.f32.gmra.mxu1 %vm411_vm2, %v4655_v27 }
  0x8c   : > { %4074 = vmatprep.mubr.msk.f32.mxu1 %vm411_vm2, %v4689_v13 }
  0x8d   : > { %4125 = vmatmul.mubr.msk.f32.gmra.mxu0 %vm411_vm2, %v6294_v47  ;;  %v6296_v47 = vld [vmem:[#allocation3_spill] sm:$0xff] }
  0x8e   : > { %4127 = vmatprep.mubr.msk.f32.mxu0 %vm411_vm2, %v4785_v20  ;;  %v6297_v20 = vld [vmem:[#allocation5_spill] sm:$0xff] }
  0x8f   : > { %4075 = vmatmul.mubr.msk.f32.gmra.mxu1 %vm411_vm2, %v4701_v57 }
  0x90   : > { %4077 = vmatprep.mubr.msk.f32.mxu1 %vm411_vm2, %v4735_v4 }
  0x91   : > { %4128 = vmatmul.mubr.msk.f32.gmra.mxu0 %vm411_vm2, %v4800_v28  ;;  %v6298_v28 = vld [vmem:[#allocation7_spill] sm:$0xff] }
  0x92   : > { %4130 = vmatprep.mubr.msk.f32.mxu0 %vm411_vm2, %v6295_v25  ;;  %v6299_v25 = vld [vmem:[#allocation9_spill] sm:$0xff] }
  0x93   : > { %4078 = vmatmul.mubr.msk.f32.gmra.mxu1 %vm411_vm2, %v4747_v39 }
  0x94   : > { %4080 = vmatprep.mubr.msk.f32.mxu1 %vm411_vm2, %v4436_v8 }
  0x95   : > { %4131 = vmatmul.mubr.msk.f32.gmra.mxu0 %vm411_vm2, %v6296_v47  ;;  %v6300_v47 = vld [vmem:[#allocation11_spill] sm:$0xff] }
  0x96   : > { %4133 = vmatprep.mubr.msk.f32.mxu0 %vm411_vm2, %v6297_v20  ;;  %v6301_v20 = vld [vmem:[#allocation13_spill] sm:$0xff] }
  0x97   : > { %4081 = vmatmul.mubr.msk.f32.gmra.mxu1 %vm411_vm2, %v4438_v9 }
  0x98   : > { %4083 = vmatprep.mubr.msk.f32.mxu1 %vm411_vm2, %v4472_v30 }
  0x99   : > { %4134 = vmatmul.mubr.msk.f32.gmra.mxu0 %vm411_vm2, %v6298_v28  ;;  %v6302_v28 = vld [vmem:[#allocation15_spill] sm:$0xff] }
  0x9a   : > { %4136 = vmatprep.mubr.msk.f32.mxu0 %vm411_vm2, %v6299_v25  ;;  %v6303_v25 = vld [vmem:[#allocation17_spill] sm:$0xff] }
  0x9b   : > { %4084 = vmatmul.mubr.msk.f32.gmra.mxu1 %vm411_vm2, %v4482_v34 }
  0x9c   : > { %4086 = vmatprep.mubr.msk.f32.mxu1 %vm411_vm2, %v4515_v46 }
  0x9d   : > { %4137 = vmatmul.mubr.msk.f32.gmra.mxu0 %vm411_vm2, %v6300_v47  ;;  %v3609_v47 = vld [vmem:[%s4425_s23 + $0xc0] sm:$0xff]  }
  0x9e   : > { %4139 = vmatprep.mubr.msk.f32.mxu0 %vm411_vm2, %v6301_v20  ;;  %v6305_v20 = vld [vmem:[#allocation21_spill] sm:$0xff]  ;;  %v5226_v37 = vunpack.c.h.bf16 %v3609_v47 }
  0x9f   : > { %4087 = vmatmul.mubr.msk.f32.gmra.mxu1 %vm411_vm2, %v4525_v50 }
  0xa0   : > { %4089 = vmatprep.mubr.msk.f32.mxu1 %vm411_vm2, %v4565_v2 }
  0xa1   : > { %4140 = vmatmul.mubr.msk.f32.gmra.mxu0 %vm411_vm2, %v6302_v28  ;;  %v5224_v28 = vunpack.c.l.bf16 %v3609_v47  ;;  %v1674_v47 = vrot.slane %v5226_v37, 1 }
  0xa2   : > { %4142 = vmatprep.mubr.msk.f32.mxu0 %vm411_vm2, %v6303_v25  ;;  %v5229_v25 = vld [vmem:[%s4425_s23 + $0xc8] sm:$0x1] }
  0xa3   : > { %4090 = vmatmul.mubr.msk.f32.gmra.mxu1 %vm411_vm2, %v4581_v18  ;;  %v1673_v26 = vrot.slane %v5224_v28, 1 }
  0xa4   : > { %4092 = vmatprep.mubr.msk.f32.mxu1 %vm411_vm2, %v4611_v48 }
  0xa5   : > { %4143 = vmatmul.mubr.msk.f32.gmra.mxu0 %vm411_vm2, %v6304_v60  ;;  %v6307_v60 = vld [vmem:[#allocation25_spill] sm:$0xff] }
  0xa6   : > { %4145 = vmatprep.mubr.msk.f32.mxu0 %vm411_vm2, %v6305_v20  ;;  %v6218_v20 = vunpack.c.l.bf16 %v5229_v25 }
  0xa7   : > { %4093 = vmatmul.mubr.msk.f32.gmra.mxu1 %vm411_vm2, %v4625_v59 }
  0xa8   : > { %4095 = vmatprep.mubr.msk.f32.mxu1 %vm411_vm2, %v4657_v56 }
  0xa9   : > { %4146 = vmatmul.mubr.msk.f32.gmra.mxu0 %vm411_vm2, %v6306_v10  ;;  %v5253_v10 = vsel %vm328_vm1, %v1673_v26, %v1674_v47 }
  0xaa   : > { %4148 = vmatprep.mubr.msk.f32.mxu0 %vm411_vm2, %v6307_v60  ;;  %v1676_v60 = vrot.slane %v6218_v20, 1  ;;  %6309 = vst [vmem:[#allocation4_spill] sm:$0xff] %v5253_v10 }
  0xab   : > { %4096 = vmatmul.mubr.msk.f32.gmra.mxu1 %vm411_vm2, %v4671_v23 }
  0xac   : > { %4098 = vmatprep.mubr.msk.f32.mxu1 %vm411_vm2, %v4703_v58 }
  0xad   : > { %4149 = vmatmul.mubr.msk.f32.gmra.mxu0 %vm411_vm2, %v6308_v16 }
  0xae   : > { %4151 = vmatprep.mubr.msk.f32.mxu0 %vm411_vm2, %v4793_v12  ;;  %v5262_v12 = vsel %vm328_vm1, %v1674_v47, %v1676_v60  ;;  %v1944_v60 = vrot.slane %v5224_v28, 2 }
  0xaf   : > { %4099 = vmatmul.mubr.msk.f32.gmra.mxu1 %vm411_vm2, %v4717_v11  ;;  %6310 = vst [vmem:[#allocation6_spill] sm:$0xff] %v5262_v12 }
  0xb0   : > { %4101 = vmatprep.mubr.msk.f32.mxu1 %vm411_vm2, %v4749_v61 }
  0xb1   : > { %4152 = vmatmul.mubr.msk.f32.gmra.mxu0 %vm411_vm2, %v4806_v54 }
  0xb2   : > { %4154 = vmatprep.mubr.msk.f32.mxu0 %vm411_vm2, %v5253_v10  ;;  %v6323_v10 = vunpack.c.l.bf16 %v5229_v25 }
  0xb3   : > { %4102 = vmatmul.mubr.msk.f32.gmra.mxu1 %vm411_vm2, %v4762_v63 }
  0xb4   : > { %4104 = vmatprep.mubr.msk.f32.mxu1 %vm411_vm2, %v5224_v28  ;;  %v1947_v54 = vrot.slane %v6323_v10, 2 }
  0xb5   : > { %4155 = vmatmul.mubr.msk.f32.gmra.mxu0 %vm411_vm2, %v5262_v12 }
  0xb6   : > { %4209 = vmatprep.mubr.msk.f32.mxu0 %vm411_vm2, %v4501_v41  ;;  %v6311_v41 = vld [vmem:[#allocation32_spill] sm:$0xff] }
  0xb7   : > { %4105 = vmatmul.mubr.msk.f32.gmra.mxu1 %vm411_vm2, %v5226_v37 }
  0xb8   : > { %4159 = vmatprep.mubr.msk.f32.mxu1 %vm411_vm2, %v4822_v55  ;;  %v6313_v55 = vld [vmem:[#allocation34_spill] sm:$0xff] }
  0xb9   : > { %4210 = vmatmul.mubr.msk.f32.vlgmr.msra.gmra.mxu0 %vm411_vm2, %v4513_v45  ;;  %v6312_v45 = vld [vmem:[#allocation33_spill] sm:$0xff] }
  0xba   : > { %4308 = vmatpush3.msk.msra.mxu0 %vm476_vm0, %v5123_v5  ;;  %4212 = vmatprep.mubr.msk.f32.mxu0 %vm411_vm2, %v4561_v0  ;;  %v6314_v0 = vld [vmem:[#allocation35_spill] sm:$0xff] }
  0xbb   : > { %4160 = vmatmul.mubr.msk.f32.vlgmr.msra.gmra.mxu1 %vm411_vm2, %v4834_v6  ;;  %v222_v5 = vld [vmem:[%s4425_s23 + $0xcc] sm:$0xff]  }
  0xbc   : > { %4258 = vmatpush3.msk.msra.mxu1 %vm476_vm0, %v5114_v49  ;;  %4162 = vmatprep.mubr.msk.f32.mxu1 %vm411_vm2, %v4848_v7 }
  0xbd   : > { %4213 = vmatmul.mubr.msk.f32.gmra.mxu0 %vm411_vm2, %v4563_v1  ;;  %v6315_v1 = vld [vmem:[#allocation36_spill] sm:$0xff] }
  0xbe   : > { %4215 = vmatprep.mubr.msk.f32.mxu0 %vm411_vm2, %v4597_v31 }
  0xbf   : > { %4163 = vmatmul.mubr.msk.f32.gmra.mxu1 %vm411_vm2, %v4865_v36 }
  0xc0   : > { %4165 = vmatprep.mubr.msk.f32.mxu1 %vm411_vm2, %v4872_v38 }
  0xc1   : > { %4216 = vmatmul.mubr.msk.f32.gmra.mxu0 %vm411_vm2, %v4609_v44 }
  0xc2   : > { %4218 = vmatprep.mubr.msk.f32.mxu0 %vm411_vm2, %v4643_v22  ;;  %v6318_v22 = vld [vmem:[#allocation39_spill] sm:$0xff] }
  0xc3   : > { %4166 = vmatmul.mubr.msk.f32.gmra.mxu1 %vm411_vm2, %v4883_v62 }
  0xc4   : > { %4168 = vmatprep.mubr.msk.f32.mxu1 %vm411_vm2, %v4890_v21 }
  0xc5   : > { %4219 = vmatmul.mubr.msk.f32.gmra.mxu0 %vm411_vm2, %v4655_v27 }
  0xc6   : > { %4221 = vmatprep.mubr.msk.f32.mxu0 %vm411_vm2, %v4689_v13 }
  0xc7   : > { %4169 = vmatmul.mubr.msk.f32.gmra.mxu1 %vm411_vm2, %v6311_v41 }
  0xc8   : > { %4171 = vmatprep.mubr.msk.f32.mxu1 %vm411_vm2, %v4908_v29 }
  0xc9   : > { %4222 = vmatmul.mubr.msk.f32.gmra.mxu0 %vm411_vm2, %v4701_v57  ;;  %v6319_v57 = vld [vmem:[#allocation40_spill] sm:$0xff] }
  0xca   : > { %4224 = vmatprep.mubr.msk.f32.mxu0 %vm411_vm2, %v4735_v4 }
  0xcb   : > { %4172 = vmatmul.mubr.msk.f32.gmra.mxu1 %vm411_vm2, %v6312_v45 }
  0xcc   : > { %4174 = vmatprep.mubr.msk.f32.mxu1 %vm411_vm2, %v4926_v19 }
  0xcd   : > { %4225 = vmatmul.mubr.msk.f32.gmra.mxu0 %vm411_vm2, %v4747_v39 }
  0xce   : > { %4227 = vmatprep.mubr.msk.f32.mxu0 %vm411_vm2, %v4436_v8 }
  0xcf   : > { %4175 = vmatmul.mubr.msk.f32.gmra.mxu1 %vm411_vm2, %v6313_v55 }
  0xd0   : > { %4177 = vmatprep.mubr.msk.f32.mxu1 %vm411_vm2, %v4944_v40 }
  0xd1   : > { %4228 = vmatmul.mubr.msk.f32.gmra.mxu0 %vm411_vm2, %v4438_v9 }
  0xd2   : > { %4230 = vmatprep.mubr.msk.f32.mxu0 %vm411_vm2, %v4472_v30  ;;  %v6316_v30 = vld [vmem:[#allocation37_spill] sm:$0xff] }
  0xd3   : > { %4178 = vmatmul.mubr.msk.f32.gmra.mxu1 %vm411_vm2, %v6314_v0 }
  0xd4   : > { %4180 = vmatprep.mubr.msk.f32.mxu1 %vm411_vm2, %v4962_v52 }
  0xd5   : > { %4231 = vmatmul.mubr.msk.f32.gmra.mxu0 %vm411_vm2, %v4482_v34 }
  0xd6   : > { %4233 = vmatprep.mubr.msk.f32.mxu0 %vm411_vm2, %v4515_v46 }
  0xd7   : > { %4181 = vmatmul.mubr.msk.f32.gmra.mxu1 %vm411_vm2, %v6315_v1 }
  0xd8   : > { %4183 = vmatprep.mubr.msk.f32.mxu1 %vm411_vm2, %v4980_v33  ;;  %v5342_v8 = vpop.f32.mrf.mxu0 }
  0xd9   : > { %v5344_v9 = vpop.f32.mrf.mxu1  ;;  %4234 = vmatmul.mubr.msk.f32.gmra.mxu0 %vm411_vm2, %v4525_v50  ;;  %v6317_v50 = vld [vmem:[#allocation38_spill] sm:$0xff] }
  0xda   : > { %4236 = vmatprep.mubr.msk.f32.mxu0 %vm411_vm2, %v4565_v2  ;;  %v5352_v34 = vpop.f32.mrf.mxu0 }
  0xdb   : > { %4184 = vmatmul.mubr.msk.f32.gmra.mxu1 %vm411_vm2, %v6316_v30  ;;  %v5354_v31 = vpop.f32.mrf.mxu1 }
  0xdc   : > { %4186 = vmatprep.mubr.msk.f32.mxu1 %vm411_vm2, %v4998_v42  ;;  %v5358_v46 = vpop.f32.mrf.mxu0 }
  0xdd   : > { %4237 = vmatmul.mubr.msk.f32.gmra.mxu0 %vm411_vm2, %v4581_v18  ;;  %v5362_v39 = vpop.f32.mrf.mxu1 }
  0xde   : > { %4239 = vmatprep.mubr.msk.f32.mxu0 %vm411_vm2, %v4611_v48  ;;  %v5368_v2 = vpop.f32.mrf.mxu0 }
  0xdf   : > { %4187 = vmatmul.mubr.msk.f32.gmra.mxu1 %vm411_vm2, %v6317_v50  ;;  %v5372_v44 = vpop.f32.mrf.mxu1 }
  0xe0   : > { %4189 = vmatprep.mubr.msk.f32.mxu1 %vm411_vm2, %v5016_v51  ;;  %v5374_v4 = vpop.f32.mrf.mxu0 }
  0xe1   : > { %4240 = vmatmul.mubr.msk.f32.gmra.mxu0 %vm411_vm2, %v4625_v59  ;;  %v5378_v18 = vpop.f32.mrf.mxu1 }
  0xe2   : > { %4242 = vmatprep.mubr.msk.f32.mxu0 %vm411_vm2, %v4657_v56  ;;  %v5384_v48 = vpop.f32.mrf.mxu0 }
  0xe3   : > { %4190 = vmatmul.mubr.msk.f32.gmra.mxu1 %vm411_vm2, %v6318_v22  ;;  %v5388_v27 = vpop.f32.mrf.mxu1 }
  0xe4   : > { %4192 = vmatprep.mubr.msk.f32.mxu1 %vm411_vm2, %v5034_v32  ;;  %v5390_v13 = vpop.f32.mrf.mxu0 }
  0xe5   : > { %4243 = vmatmul.mubr.msk.f32.gmra.mxu0 %vm411_vm2, %v4671_v23  ;;  %v5394_v59 = vpop.f32.mrf.mxu1 }
  0xe6   : > { %4245 = vmatprep.mubr.msk.f32.mxu0 %vm411_vm2, %v4703_v58  ;;  %v5400_v56 = vpop.f32.mrf.mxu0 }
  0xe7   : > { %4193 = vmatmul.mubr.msk.f32.gmra.mxu1 %vm411_vm2, %v6319_v57  ;;  %v5404_v6 = vpop.f32.mrf.mxu1 }
  0xe8   : > { %4195 = vmatprep.mubr.msk.f32.mxu1 %vm411_vm2, %v5052_v43  ;;  %v5406_v49 = vpop.f32.mrf.mxu0 }
  0xe9   : > { %4246 = vmatmul.mubr.msk.f32.gmra.mxu0 %vm411_vm2, %v4717_v11  ;;  %v5410_v23 = vpop.f32.mrf.mxu1  ;;  %v1945_v11 = vrot.slane %v5226_v37, 2 }
  0xea   : > { %6320 = vst [vmem:[#allocation8_spill] sm:$0xff] %v5410_v23  ;;  %4248 = vmatprep.mubr.msk.f32.mxu0 %vm411_vm2, %v4749_v61  ;;  %v5416_v58 = vpop.f32.mrf.mxu0  ;;  %v5435_v61 = vunpack.c.l.bf16 %v222_v5 }
  0xeb   : > { %4196 = vmatmul.mubr.msk.f32.gmra.mxu1 %vm411_vm2, %v5063_v24  ;;  %v5421_v26 = vpop.f32.mrf.mxu1  ;;  %v5465_v25 = vsel %vm997_vm3, %v1945_v11, %v1947_v54 }
  0xec   : > { %4198 = vmatprep.mubr.msk.f32.mxu1 %vm411_vm2, %v5070_v17  ;;  %6321 = vst [vmem:[#allocation10_spill] sm:$0xff] %v5421_v26  ;;  %v5425_v47 = vpop.f32.mrf.mxu0  ;;  %6327 = vst [vmem:[#allocation35_spill] sm:$0xff] %v5465_v25 }
  0xed   : > { %4249 = vmatmul.mubr.msk.f32.gmra.mxu0 %vm411_vm2, %v4762_v63  ;;  %v5446_v63 = vsel %vm997_vm3, %v1944_v60, %v1945_v11 }
  0xee   : > { %v5429_v20 = vpop.f32.mrf.mxu1  ;;  %4251 = vmatprep.mubr.msk.f32.mxu0 %vm411_vm2, %v5224_v28  ;;  %v5437_v12 = vpop.f32.mrf.mxu0  ;;  %6325 = vst [vmem:[#allocation33_spill] sm:$0xff] %v5446_v63  ;;  %v5452_v28 = vunpack.c.h.bf16 %v222_v5 }
  0xef   : > { %6322 = vst [vmem:[#allocation27_spill] sm:$0xff] %v5429_v20  ;;  %4199 = vmatmul.mubr.msk.f32.gmra.mxu1 %vm411_vm2, %v5081_v35 }
  0xf0   : > { %4201 = vmatprep.mubr.msk.f32.mxu1 %vm411_vm2, %v5088_v53  ;;  %v5443_v26 = vpop.f32.mrf.mxu1  ;;  %v5448_v20 = vpop.f32.mrf.mxu0 }
  0xf1   : > { %6324 = vst [vmem:[#allocation32_spill] sm:$0xff] %v5443_v26  ;;  %4252 = vmatmul.mubr.msk.f32.gmra.mxu0 %vm411_vm2, %v5226_v37 }
  0xf2   : > { %4254 = vmatprep.mubr.msk.f32.mxu0 %vm411_vm2, %v5435_v61  ;;  %v5460_v10 = vpop.f32.mrf.mxu0 }
  0xf3   : > { %v5454_v23 = vpop.f32.mrf.mxu1  ;;  %4202 = vmatmul.mubr.msk.f32.gmra.mxu1 %vm411_vm2, %v5097_v3 }
  0xf4   : > { %6326 = vst [vmem:[#allocation34_spill] sm:$0xff] %v5454_v23  ;;  %4204 = vmatprep.mubr.msk.f32.mxu1 %vm411_vm2, %v5446_v63 }
  0xf5   : > { %v5467_v60 = vpop.f32.mrf.mxu1  ;;  %v5469_v37 = vpop.f32.mrf.mxu0  ;;  %4255 = vmatmul.mubr.msk.f32.gmra.mxu0 %vm411_vm2, %v5452_v28 }
  0xf6   : > { %6328 = vst [vmem:[#allocation36_spill] sm:$0xff] %v5467_v60  ;;  %4309 = vmatprep.mubr.msk.f32.mxu0 %vm411_vm2, %v4848_v7 }
  0xf7   : > { %v5473_v5 = vpop.f32.mrf.mxu1  ;;  %4205 = vmatmul.mubr.msk.f32.gmra.mxu1 %vm411_vm2, %v5465_v25  ;;  %v5479_v23 = vpop.f32.mrf.mxu0  ;;  %v6331_v25 = vld [vmem:[#allocation12_spill] sm:$0xff] }
  0xf8   : > { %6329 = vst [vmem:[#allocation37_spill] sm:$0xff] %v5473_v5  ;;  %4259 = vmatprep.mubr.msk.f32.mxu1 %vm411_vm2, %v6285_v14 }
  0xf9   : > { %v5483_v54 = vpop.f32.mrf.mxu1  ;;  %v4011_v11 = vpop.f32.mrf.mxu0  ;;  %4310 = vmatmul.mubr.msk.f32.vlgmr.msra.gmra.mxu0 %vm411_vm2, %v4865_v36 }
  0xfa   : > { %6330 = vst [vmem:[#allocation38_spill] sm:$0xff] %v5483_v54  ;;  %4312 = vmatprep.mubr.msk.f32.mxu0 %vm411_vm2, %v4872_v38 }
  0xfb   : > { %v3961_v60 = vpop.f32.mrf.mxu1  ;;  %4260 = vmatmul.mubr.msk.f32.vlgmr.msra.gmra.mxu1 %vm411_vm2, %v6286_v15  ;;  %v1213_v5 = vpop.f32.mrf.mxu0  ;;  %v6332_v15 = vld [vmem:[#allocation14_spill] sm:$0xff] }
  0xfc   : > { %v844_v7 = vadd.f32 %v3961_v60, %v5342_v8  ;;  %4262 = vmatprep.mubr.msk.f32.mxu1 %vm411_vm2, %v6331_v25  ;;  %v6333_v60 = vld [vmem:[#allocation16_spill] sm:$0xff] }
  0xfd   : > { %v838_v14 = vpop.f32.mrf.mxu1  ;;  %v4014_v63 = vpop.f32.mrf.mxu0  ;;  %4313 = vmatmul.mubr.msk.f32.gmra.mxu0 %vm411_vm2, %v4883_v62 }
  0xfe   : > { %v5494_v26 = vadd.f32 %v4011_v11, %v844_v7  ;;  %v839_v54 = vadd.f32 %v838_v14, %v5352_v34  ;;  %4315 = vmatprep.mubr.msk.f32.mxu0 %vm411_vm2, %v4890_v21 }
  0xff   : > { %v3964_v36 = vpop.f32.mrf.mxu1  ;;  %4263 = vmatmul.mubr.msk.f32.gmra.mxu1 %vm411_vm2, %v6332_v15  ;;  %v1223_v25 = vpop.f32.mrf.mxu0  ;;  %v6334_v15 = vld [vmem:[#allocation18_spill] sm:$0xff] }
 0x100   : > { %v5503_v38 = vadd.f32 %v1213_v5, %v839_v54  ;;  %v854_v8 = vadd.f32 %v3964_v36, %v5358_v46  ;;  %4265 = vmatprep.mubr.msk.f32.mxu1 %vm411_vm2, %v6333_v60  ;;  %v6336_v60 = vld [vmem:[#allocation22_spill] sm:$0xff] }
 0x101   : > { %v848_v34 = vpop.f32.mrf.mxu1  ;;  %v4017_v7 = vpop.f32.mrf.mxu0  ;;  %4316 = vmatmul.mubr.msk.f32.gmra.mxu0 %vm411_vm2, %v6311_v41 }
 0x102   : > { %v5508_v11 = vadd.f32 %v4014_v63, %v854_v8  ;;  %v849_v62 = vadd.f32 %v848_v34, %v5368_v2  ;;  %4318 = vmatprep.mubr.msk.f32.mxu0 %vm411_vm2, %v4908_v29  ;;  %v6335_v63 = vld [vmem:[#allocation20_spill] sm:$0xff] }
 0x103   : > { %v3967_v14 = vpop.f32.mrf.mxu1  ;;  %4266 = vmatmul.mubr.msk.f32.gmra.mxu1 %vm411_vm2, %v6334_v15  ;;  %v1233_v5 = vpop.f32.mrf.mxu0  ;;  %v6337_v34 = vld [vmem:[#allocation24_spill] sm:$0xff]  ;;  %v6338_v15 = vld [vmem:[#allocation26_spill] sm:$0xff] }
 0x104   : > { %v5517_v21 = vadd.f32 %v1223_v25, %v849_v62  ;;  %v864_v46 = vadd.f32 %v3967_v14, %v5374_v4  ;;  %4268 = vmatprep.mubr.msk.f32.mxu1 %vm411_vm2, %v6335_v63 }
 0x105   : > { %v858_v2 = vpop.f32.mrf.mxu1  ;;  %v4020_v36 = vpop.f32.mrf.mxu0  ;;  %4319 = vmatmul.mubr.msk.f32.gmra.mxu0 %vm411_vm2, %v6312_v45 }
 0x106   : > { %v5522_v54 = vadd.f32 %v4017_v7, %v864_v46  ;;  %v859_v41 = vadd.f32 %v858_v2, %v5384_v48  ;;  %4321 = vmatprep.mubr.msk.f32.mxu0 %vm411_vm2, %v4926_v19 }
 0x107   : > { %v3970_v8 = vpop.f32.mrf.mxu1  ;;  %4269 = vmatmul.mubr.msk.f32.gmra.mxu1 %vm411_vm2, %v6336_v60  ;;  %v1243_v25 = vpop.f32.mrf.mxu0  ;;  %v6341_v60 = vld [vmem:[#allocation2_spill] sm:$0xff] }
 0x108   : > { %v5531_v29 = vadd.f32 %v1233_v5, %v859_v41  ;;  %v874_v4 = vadd.f32 %v3970_v8, %v5390_v13  ;;  %4271 = vmatprep.mubr.msk.f32.mxu1 %vm411_vm2, %v6337_v34  ;;  %v6339_v5 = vld [vmem:[#allocation28_spill] sm:$0xff] }
 0x109   : > { %v868_v48 = vpop.f32.mrf.mxu1  ;;  %v4023_v7 = vpop.f32.mrf.mxu0  ;;  %4322 = vmatmul.mubr.msk.f32.gmra.mxu0 %vm411_vm2, %v6313_v55 }
 0x10a   : > { %v5536_v62 = vadd.f32 %v4020_v36, %v874_v4  ;;  %v869_v45 = vadd.f32 %v868_v48, %v5400_v56  ;;  %4324 = vmatprep.mubr.msk.f32.mxu0 %vm411_vm2, %v4944_v40  ;;  %v6340_v36 = vld [vmem:[#allocation30_spill] sm:$0xff]  ;;  %v6342_v48 = vld [vmem:[#allocation3_spill] sm:$0xff] }
 0x10b   : > { %v3973_v14 = vpop.f32.mrf.mxu1  ;;  %4272 = vmatmul.mubr.msk.f32.gmra.mxu1 %vm411_vm2, %v6338_v15  ;;  %v1253_v46 = vpop.f32.mrf.mxu0 }
 0x10c   : > { %v5545_v19 = vadd.f32 %v1243_v25, %v869_v45  ;;  %v884_v13 = vadd.f32 %v3973_v14, %v5406_v49  ;;  %4274 = vmatprep.mubr.msk.f32.mxu1 %vm411_vm2, %v6339_v5 }
 0x10d   : > { %v878_v56 = vpop.f32.mrf.mxu1  ;;  %v4026_v2 = vpop.f32.mrf.mxu0  ;;  %4325 = vmatmul.mubr.msk.f32.gmra.mxu0 %vm411_vm2, %v6314_v0 }
 0x10e   : > { %v5550_v63 = vadd.f32 %v4023_v7, %v884_v13  ;;  %v879_v55 = vadd.f32 %v878_v56, %v5416_v58  ;;  %4327 = vmatprep.mubr.msk.f32.mxu0 %vm411_vm2, %v4962_v52  ;;  %v6343_v7 = vld [vmem:[#allocation5_spill] sm:$0xff] }
 0x10f   : > { %v3976_v41 = vpop.f32.mrf.mxu1  ;;  %4275 = vmatmul.mubr.msk.f32.gmra.mxu1 %vm411_vm2, %v6340_v36  ;;  %v1263_v8 = vpop.f32.mrf.mxu0  ;;  %v6345_v56 = vld [vmem:[#allocation9_spill] sm:$0xff]  ;;  %v6346_v36 = vld [vmem:[#allocation11_spill] sm:$0xff] }
 0x110   : > { %v5559_v40 = vadd.f32 %v1253_v46, %v879_v55  ;;  %v894_v49 = vadd.f32 %v3976_v41, %v5425_v47  ;;  %4277 = vmatprep.mubr.msk.f32.mxu1 %vm411_vm2, %v6341_v60  ;;  %v6344_v46 = vld [vmem:[#allocation7_spill] sm:$0xff] }
 0x111   : > { %v888_v58 = vpop.f32.mrf.mxu1  ;;  %v4029_v25 = vpop.f32.mrf.mxu0  ;;  %4328 = vmatmul.mubr.msk.f32.gmra.mxu0 %vm411_vm2, %v6315_v1 }
 0x112   : > { %v5564_v4 = vadd.f32 %v4026_v2, %v894_v49  ;;  %v889_v0 = vadd.f32 %v888_v58, %v5437_v12  ;;  %4330 = vmatprep.mubr.msk.f32.mxu0 %vm411_vm2, %v4980_v33 }
 0x113   : > { %v3979_v34 = vpop.f32.mrf.mxu1  ;;  %4278 = vmatmul.mubr.msk.f32.gmra.mxu1 %vm411_vm2, %v6342_v48  ;;  %v1273_v45 = vpop.f32.mrf.mxu0  ;;  %v6349_v48 = vld [vmem:[#allocation17_spill] sm:$0xff] }
 0x114   : > { %v5573_v52 = vadd.f32 %v1263_v8, %v889_v0  ;;  %v904_v47 = vadd.f32 %v3979_v34, %v5448_v20  ;;  %4280 = vmatprep.mubr.msk.f32.mxu1 %vm411_vm2, %v6343_v7  ;;  %v6347_v8 = vld [vmem:[#allocation13_spill] sm:$0xff] }
 0x115   : > { %v898_v12 = vpop.f32.mrf.mxu1  ;;  %v4032_v15 = vpop.f32.mrf.mxu0  ;;  %4331 = vmatmul.mubr.msk.f32.gmra.mxu0 %vm411_vm2, %v6316_v30 }
 0x116   : > { %v5578_v14 = vadd.f32 %v4029_v25, %v904_v47  ;;  %v899_v1 = vadd.f32 %v898_v12, %v5460_v10  ;;  %4333 = vmatprep.mubr.msk.f32.mxu0 %vm411_vm2, %v4998_v42  ;;  %v6348_v25 = vld [vmem:[#allocation15_spill] sm:$0xff] }
 0x117   : > { %v3982_v13 = vpop.f32.mrf.mxu1  ;;  %4281 = vmatmul.mubr.msk.f32.gmra.mxu1 %vm411_vm2, %v6344_v46  ;;  %v1283_v5 = vpop.f32.mrf.mxu0  ;;  %v6350_v12 = vld [vmem:[#allocation19_spill] sm:$0xff] }
 0x118   : > { %v5587_v20 = vadd.f32 %v1273_v45, %v899_v1  ;;  %v914_v33 = vadd.f32 %v3982_v13, %v5469_v37  ;;  %4283 = vmatprep.mubr.msk.f32.mxu1 %vm411_vm2, %v6345_v56 }
 0x119   : > { %v908_v10 = vpop.f32.mrf.mxu1  ;;  %v4035_v2 = vpop.f32.mrf.mxu0  ;;  %4334 = vmatmul.mubr.msk.f32.gmra.mxu0 %vm411_vm2, %v6317_v50 }
 0x11a   : > { %v5592_v55 = vadd.f32 %v4032_v15, %v914_v33  ;;  %v909_v30 = vadd.f32 %v908_v10, %v5479_v23  ;;  %4336 = vmatprep.mubr.msk.f32.mxu0 %vm411_vm2, %v5016_v51  ;;  %v6351_v15 = vld [vmem:[#allocation21_spill] sm:$0xff] }
 0x11b   : > { %v3985_v41 = vpop.f32.mrf.mxu1  ;;  %4284 = vmatmul.mubr.msk.f32.gmra.mxu1 %vm411_vm2, %v6346_v36  ;;  %v1293_v49 = vpop.f32.mrf.mxu0  ;;  %v6353_v10 = vld [vmem:[#allocation25_spill] sm:$0xff] }
 0x11c   : > { %v5601_v42 = vadd.f32 %v1283_v5, %v909_v30  ;;  %v924_v37 = vadd.f32 %v3985_v41, %v5344_v9  ;;  %4286 = vmatprep.mubr.msk.f32.mxu1 %vm411_vm2, %v6347_v8 }
 0x11d   : > { %v918_v23 = vpop.f32.mrf.mxu1  ;;  %v4038_v58 = vpop.f32.mrf.mxu0  ;;  %4337 = vmatmul.mubr.msk.f32.gmra.mxu0 %vm411_vm2, %v6318_v22 }
 0x11e   : > { %v5606_v60 = vadd.f32 %v4035_v2, %v924_v37  ;;  %v919_v50 = vadd.f32 %v918_v23, %v5354_v31  ;;  %4339 = vmatprep.mubr.msk.f32.mxu0 %vm411_vm2, %v5034_v32  ;;  %v6354_v37 = vld [vmem:[#allocation8_spill] sm:$0xff]  ;;  %v6355_v23 = vld [vmem:[#allocation29_spill] sm:$0xff] }
 0x11f   : > { %v3988_v0 = vpop.f32.mrf.mxu1  ;;  %4287 = vmatmul.mubr.msk.f32.gmra.mxu1 %vm411_vm2, %v6348_v25  ;;  %v1303_v34 = vpop.f32.mrf.mxu0 }
 0x120   : > { %v5615_v51 = vadd.f32 %v1293_v49, %v919_v50  ;;  %v934_v9 = vadd.f32 %v3988_v0, %v5362_v39  ;;  %4289 = vmatprep.mubr.msk.f32.mxu1 %vm411_vm2, %v6349_v48  ;;  %v6357_v48 = vld [vmem:[#allocation31_spill] sm:$0xff] }
 0x121   : > { %v928_v31 = vpop.f32.mrf.mxu1  ;;  %v4041_v45 = vpop.f32.mrf.mxu0  ;;  %4340 = vmatmul.mubr.msk.f32.gmra.mxu0 %vm411_vm2, %v6319_v57 }
 0x122   : > { %v5620_v47 = vadd.f32 %v4038_v58, %v934_v9  ;;  %v929_v22 = vadd.f32 %v928_v31, %v5372_v44  ;;  %4342 = vmatprep.mubr.msk.f32.mxu0 %vm411_vm2, %v5052_v43  ;;  %v6352_v43 = vld [vmem:[#allocation23_spill] sm:$0xff]  ;;  %v2484_v58 = vrot.slane %v5435_v61, 1  ;;  %v6358_v31 = vld [vmem:[#allocation33_spill] sm:$0xff] }
 0x123   : > { %v3991_v7 = vpop.f32.mrf.mxu1  ;;  %4290 = vmatmul.mubr.msk.f32.gmra.mxu1 %vm411_vm2, %v6350_v12  ;;  %v1313_v1 = vpop.f32.mrf.mxu0  ;;  %v6360_v12 = vld [vmem:[#allocation4_spill] sm:$0xff] }
 0x124   : > { %v5629_v32 = vadd.f32 %v1303_v34, %v929_v22  ;;  %v944_v39 = vadd.f32 %v3991_v7, %v5378_v18  ;;  %4292 = vmatprep.mubr.msk.f32.mxu1 %vm411_vm2, %v6351_v15 }
 0x125   : > { %v938_v44 = vpop.f32.mrf.mxu1  ;;  %v4044_v46 = vpop.f32.mrf.mxu0  ;;  %4343 = vmatmul.mubr.msk.f32.gmra.mxu0 %vm411_vm2, %v5063_v24 }
 0x126   : > { %v5634_v13 = vadd.f32 %v4041_v45, %v944_v39  ;;  %v939_v57 = vadd.f32 %v938_v44, %v5388_v27  ;;  %4345 = vmatprep.mubr.msk.f32.mxu0 %vm411_vm2, %v5070_v17  ;;  %v224_v27 = vld [vmem:[%s4425_s23 + $0xd4] sm:$0x1] }
 0x127   : > { %v3994_v33 = vpop.f32.mrf.mxu1  ;;  %4293 = vmatmul.mubr.msk.f32.gmra.mxu1 %vm411_vm2, %v6352_v43  ;;  %v1323_v56 = vpop.f32.mrf.mxu0  ;;  %v278_v17 = vunpack.c.l.bf16 %v224_v27  ;;  %v6362_v43 = vld [vmem:[#allocation35_spill] sm:$0xff] }
 0x128   : > { %v5643_v18 = vadd.f32 %v1313_v1, %v939_v57  ;;  %v954_v5 = vadd.f32 %v3994_v33, %v5394_v59  ;;  %4295 = vmatprep.mubr.msk.f32.mxu1 %vm411_vm2, %v6353_v10  ;;  %v6361_v57 = vld [vmem:[#allocation32_spill] sm:$0xff] }
 0x129   : > { %v948_v30 = vpop.f32.mrf.mxu1  ;;  %v4047_v41 = vpop.f32.mrf.mxu0  ;;  %4346 = vmatmul.mubr.msk.f32.gmra.mxu0 %vm411_vm2, %v5081_v35  ;;  %v2756_v35 = vrot.slane %v5452_v28, 2  ;;  %v2758_v22 = vrot.slane %v278_v17, 2  ;;  %v2487_v1 = vrot.slane %v278_v17, 1 }
 0x12a   : > { %v5649_v2 = vadd.f32 %v4044_v46, %v954_v5  ;;  %v949_v24 = vadd.f32 %v948_v30, %v5404_v6  ;;  %4348 = vmatprep.mubr.msk.f32.mxu0 %vm411_vm2, %v5088_v53  ;;  %v2755_v6 = vrot.slane %v5435_v61, 2  ;;  %v6356_v53 = vld [vmem:[#allocation10_spill] sm:$0xff]  ;;  %v6359_v61 = vld [vmem:[#allocation27_spill] sm:$0xff] }
 0x12b   : > { %v3997_v36 = vpop.f32.mrf.mxu1  ;;  %4296 = vmatmul.mubr.msk.f32.gmra.mxu1 %vm411_vm2, %v6308_v16  ;;  %v1333_v8 = vpop.f32.mrf.mxu0  ;;  %v2485_v16 = vrot.slane %v5452_v28, 1  ;;  %v2759_v10 = vsel %vm997_vm3, %v2756_v35, %v2758_v22  ;;  %v6364_v30 = vld [vmem:[#allocation34_spill] sm:$0xff] }
 0x12c   : > { %v5658_v59 = vadd.f32 %v1323_v56, %v949_v24  ;;  %v964_v49 = vadd.f32 %v3997_v36, %v6354_v37  ;;  %4298 = vmatprep.mubr.msk.f32.mxu1 %vm411_vm2, %v6355_v23  ;;  %v2757_v39 = vsel %vm997_vm3, %v2755_v6, %v2756_v35  ;;  %v6363_v56 = vld [vmem:[#allocation6_spill] sm:$0xff] }
 0x12d   : > { %v958_v50 = vpop.f32.mrf.mxu1  ;;  %v4050_v9 = vpop.f32.mrf.mxu0  ;;  %4349 = vmatmul.mubr.msk.f32.gmra.mxu0 %vm411_vm2, %v5097_v3  ;;  %v2486_v15 = vsel %vm328_vm1, %v2484_v58, %v2485_v16  ;;  %v2488_v36 = vsel %vm328_vm1, %v2485_v16, %v2487_v1  ;;  %v6367_v16 = vld [vmem:[#allocation38_spill] sm:$0xff] }
 0x12e   : > { %v5667_v0 = vadd.f32 %v4047_v41, %v964_v49  ;;  %v959_v25 = vadd.f32 %v958_v50, %v6356_v53  ;;  %4351 = vmatprep.mubr.msk.f32.mxu0 %vm411_vm2, %v6358_v31  ;;  %v6365_v49 = vld [vmem:[#allocation36_spill] sm:$0xff]  ;;  %v6366_v50 = vld [vmem:[#allocation37_spill] sm:$0xff] }
 0x12f   : > { %v4000_v34 = vpop.f32.mrf.mxu1  ;;  %4299 = vmatmul.mubr.msk.f32.gmra.mxu1 %vm411_vm2, %v6357_v48  ;;  %v1343_v7 = vpop.f32.mrf.mxu0 }
 0x130   : > { %v5676_v45 = vadd.f32 %v1333_v8, %v959_v25  ;;  %v974_v28 = vadd.f32 %v4000_v34, %v6359_v61  ;;  %4301 = vmatprep.mubr.msk.f32.mxu1 %vm411_vm2, %v6360_v12 }
 0x131   : > { %v968_v3 = vpop.f32.mrf.mxu1  ;;  %v4053_v33 = vpop.f32.mrf.mxu0  ;;  %4352 = vmatmul.mubr.msk.f32.gmra.mxu0 %vm411_vm2, %v6362_v43 }
 0x132   : > { %v5683_v44 = vadd.f32 %v4050_v9, %v974_v28  ;;  %v969_v46 = vadd.f32 %v968_v3, %v6361_v57  ;;  %4354 = vmatprep.mubr.msk.f32.mxu0 %vm411_vm2, %v2757_v39 }
 0x133   : > { %v4003_v5 = vpop.f32.mrf.mxu1  ;;  %4302 = vmatmul.mubr.msk.f32.gmra.mxu1 %vm411_vm2, %v6363_v56  ;;  %v1353_v41 = vpop.f32.mrf.mxu0 }
 0x134   : > { %v5692_v27 = vadd.f32 %v1343_v7, %v969_v46  ;;  %v984_v24 = vadd.f32 %v4003_v5, %v6364_v30  ;;  %4304 = vmatprep.mubr.msk.f32.mxu1 %vm411_vm2, %v2486_v15 }
 0x135   : > { %v978_v17 = vpop.f32.mrf.mxu1  ;;  %v4056_v23 = vpop.f32.mrf.mxu0  ;;  %4355 = vmatmul.mubr.msk.f32.gmra.mxu0 %vm411_vm2, %v2759_v10 }
 0x136   : > { %v5697_v37 = vadd.f32 %v4053_v33, %v984_v24  ;;  %v979_v8 = vadd.f32 %v978_v17, %v6365_v49 }
 0x137   : > { %v4006_v6 = vpop.f32.mrf.mxu1  ;;  %4305 = vmatmul.mubr.msk.f32.gmra.mxu1 %vm411_vm2, %v2488_v36  ;;  %v1363_v53 = vpop.f32.mrf.mxu0 }
 0x138   : > { %v5702_v35 = vadd.f32 %v1353_v41, %v979_v8  ;;  %v994_v58 = vadd.f32 %v4006_v6, %v6366_v50 }
 0x139   : > { %v988_v25 = vpop.f32.mrf.mxu1  ;;  %v4111_v48 = vpop.f32.mrf.mxu0 }
 0x13a   : > { %v5705_v9 = vadd.f32 %v4056_v23, %v994_v58  ;;  %v989_v34 = vadd.f32 %v988_v25, %v6367_v16 }
 0x13b   : > { %v4061_v31 = vpop.f32.mrf.mxu1  ;;  %v1753_v28 = vpop.f32.mrf.mxu0 }
 0x13c   : > { %v5708_v22 = vadd.f32 %v1363_v53, %v989_v34  ;;  %v1641_v61 = vadd.f32 %v4061_v31, %v5494_v26 }
 0x13d   : > { %v1481_v7 = vpop.f32.mrf.mxu1  ;;  %v4114_v1 = vpop.f32.mrf.mxu0 }
 0x13e   : > { %v5711_v12 = vadd.f32 %v4111_v48, %v1641_v61  ;;  %v1640_v39 = vadd.f32 %v1481_v7, %v5503_v38 }
 0x13f   : > { %v4064_v3 = vpop.f32.mrf.mxu1  ;;  %v1763_v46 = vpop.f32.mrf.mxu0 }
 0x140   : > { %v5714_v15 = vadd.f32 %v1753_v28, %v1640_v39  ;;  %v1643_v57 = vadd.f32 %v4064_v3, %v5508_v11 }
 0x141   : > { %v1491_v33 = vpop.f32.mrf.mxu1  ;;  %v4117_v56 = vpop.f32.mrf.mxu0 }
 0x142   : > { %v5717_v43 = vadd.f32 %v4114_v1, %v1643_v57  ;;  %v1642_v5 = vadd.f32 %v1491_v33, %v5517_v21 }
 0x143   : > { %v4067_v26 = vpop.f32.mrf.mxu1  ;;  %v1773_v24 = vpop.f32.mrf.mxu0 }
 0x144   : > { %v5720_v10 = vadd.f32 %v1763_v46, %v1642_v5  ;;  %v1645_v30 = vadd.f32 %v4067_v26, %v5522_v54 }
 0x145   : > { %v1501_v38 = vpop.f32.mrf.mxu1  ;;  %v4120_v17 = vpop.f32.mrf.mxu0 }
 0x146   : > { %v5723_v41 = vadd.f32 %v4117_v56, %v1645_v30  ;;  %v1644_v36 = vadd.f32 %v1501_v38, %v5531_v29 }
 0x147   : > { %v4070_v11 = vpop.f32.mrf.mxu1  ;;  %v1783_v23 = vpop.f32.mrf.mxu0 }
 0x148   : > { %v5726_v49 = vadd.f32 %v1773_v24, %v1644_v36  ;;  %v1647_v8 = vadd.f32 %v4070_v11, %v5536_v62 }
 0x149   : > { %v1511_v21 = vpop.f32.mrf.mxu1  ;;  %v4123_v58 = vpop.f32.mrf.mxu0 }
 0x14a   : > { %v5729_v6 = vadd.f32 %v4120_v17, %v1647_v8  ;;  %v1646_v50 = vadd.f32 %v1511_v21, %v5545_v19 }
 0x14b   : > { %v4073_v54 = vpop.f32.mrf.mxu1  ;;  %v1793_v16 = vpop.f32.mrf.mxu0 }
 0x14c   : > { %v5732_v53 = vadd.f32 %v1783_v23, %v1646_v50  ;;  %v1649_v25 = vadd.f32 %v4073_v54, %v5550_v63 }
 0x14d   : > { %v1521_v29 = vpop.f32.mrf.mxu1  ;;  %v4126_v31 = vpop.f32.mrf.mxu0 }
 0x14e   : > { %v5735_v34 = vadd.f32 %v4123_v58, %v1649_v25  ;;  %v1648_v48 = vadd.f32 %v1521_v29, %v5559_v40 }
 0x14f   : > { %v4076_v62 = vpop.f32.mrf.mxu1  ;;  %v1803_v7 = vpop.f32.mrf.mxu0 }
 0x150   : > { %v5738_v61 = vadd.f32 %v1793_v16, %v1648_v48  ;;  %v1651_v28 = vadd.f32 %v4076_v62, %v5564_v4 }
 0x151   : > { %v1531_v19 = vpop.f32.mrf.mxu1  ;;  %v4129_v3 = vpop.f32.mrf.mxu0 }
 0x152   : > { %v5741_v39 = vadd.f32 %v4126_v31, %v1651_v28  ;;  %v1650_v1 = vadd.f32 %v1531_v19, %v5573_v52 }
 0x153   : > { %v4079_v63 = vpop.f32.mrf.mxu1  ;;  %v1813_v33 = vpop.f32.mrf.mxu0 }
 0x154   : > { %v5744_v57 = vadd.f32 %v1803_v7, %v1650_v1  ;;  %v1653_v46 = vadd.f32 %v4079_v63, %v5578_v14 }
 0x155   : > { %v1541_v40 = vpop.f32.mrf.mxu1  ;;  %v4132_v26 = vpop.f32.mrf.mxu0 }
 0x156   : > { %v5747_v5 = vadd.f32 %v4129_v3, %v1653_v46  ;;  %v1652_v56 = vadd.f32 %v1541_v40, %v5587_v20 }
 0x157   : > { %v4082_v4 = vpop.f32.mrf.mxu1  ;;  %v1823_v38 = vpop.f32.mrf.mxu0 }
 0x158   : > { %v5750_v30 = vadd.f32 %v1813_v33, %v1652_v56  ;;  %v1655_v24 = vadd.f32 %v4082_v4, %v5592_v55 }
 0x159   : > { %v1551_v52 = vpop.f32.mrf.mxu1  ;;  %v4135_v11 = vpop.f32.mrf.mxu0 }
 0x15a   : > { %v5753_v36 = vadd.f32 %v4132_v26, %v1655_v24  ;;  %v1654_v17 = vadd.f32 %v1551_v52, %v5601_v42 }
 0x15b   : > { %v4085_v14 = vpop.f32.mrf.mxu1  ;;  %v1833_v21 = vpop.f32.mrf.mxu0 }
 0x15c   : > { %v5756_v8 = vadd.f32 %v1823_v38, %v1654_v17  ;;  %v1657_v23 = vadd.f32 %v4085_v14, %v5606_v60 }
 0x15d   : > { %v1561_v20 = vpop.f32.mrf.mxu1  ;;  %v4138_v54 = vpop.f32.mrf.mxu0 }
 0x15e   : > { %v5759_v50 = vadd.f32 %v4135_v11, %v1657_v23  ;;  %v1656_v58 = vadd.f32 %v1561_v20, %v5615_v51 }
 0x15f   : > { %v4088_v55 = vpop.f32.mrf.mxu1  ;;  %v1843_v29 = vpop.f32.mrf.mxu0 }
 0x160   : > { %v5762_v25 = vadd.f32 %v1833_v21, %v1656_v58  ;;  %v1659_v16 = vadd.f32 %v4088_v55, %v5620_v47 }
 0x161   : > { %v1571_v42 = vpop.f32.mrf.mxu1  ;;  %v4141_v62 = vpop.f32.mrf.mxu0 }
 0x162   : > { %v5765_v48 = vadd.f32 %v4138_v54, %v1659_v16  ;;  %v1658_v31 = vadd.f32 %v1571_v42, %v5629_v32 }
 0x163   : > { %v4091_v60 = vpop.f32.mrf.mxu1  ;;  %v1853_v19 = vpop.f32.mrf.mxu0 }
 0x164   : > { %6368 = vst [vmem:[#allocation39_spill] sm:$0xff] %v5765_v48  ;;  %v5768_v28 = vadd.f32 %v1843_v29, %v1658_v31  ;;  %v1661_v7 = vadd.f32 %v4091_v60, %v5634_v13 }
 0x165   : > { %v1581_v51 = vpop.f32.mrf.mxu1  ;;  %v4144_v63 = vpop.f32.mrf.mxu0 }
 0x166   : > { %6369 = vst [vmem:[#allocation40_spill] sm:$0xff] %v5768_v28  ;;  %v5771_v1 = vadd.f32 %v4141_v62, %v1661_v7  ;;  %v1660_v3 = vadd.f32 %v1581_v51, %v5643_v18 }
 0x167   : > { %v4094_v47 = vpop.f32.mrf.mxu1  ;;  %v1863_v40 = vpop.f32.mrf.mxu0 }
 0x168   : > { %6370 = vst [vmem:[#allocation12_spill] sm:$0xff] %v5771_v1  ;;  %v5774_v46 = vadd.f32 %v1853_v19, %v1660_v3  ;;  %v1663_v33 = vadd.f32 %v4094_v47, %v5649_v2 }
 0x169   : > { %v1591_v32 = vpop.f32.mrf.mxu1  ;;  %v4147_v4 = vpop.f32.mrf.mxu0 }
 0x16a   : > { %6371 = vst [vmem:[#allocation14_spill] sm:$0xff] %v5774_v46  ;;  %v5777_v56 = vadd.f32 %v4144_v63, %v1663_v33  ;;  %v1662_v26 = vadd.f32 %v1591_v32, %v5658_v59 }
 0x16b   : > { %v4097_v13 = vpop.f32.mrf.mxu1  ;;  %v1873_v52 = vpop.f32.mrf.mxu0 }
 0x16c   : > { %6372 = vst [vmem:[#allocation16_spill] sm:$0xff] %v5777_v56  ;;  %v5780_v24 = vadd.f32 %v1863_v40, %v1662_v26  ;;  %v1665_v38 = vadd.f32 %v4097_v13, %v5667_v0 }
 0x16d   : > { %v1601_v18 = vpop.f32.mrf.mxu1  ;;  %v4150_v14 = vpop.f32.mrf.mxu0 }
 0x16e   : > { %6373 = vst [vmem:[#allocation18_spill] sm:$0xff] %v5780_v24  ;;  %v5783_v17 = vadd.f32 %v4147_v4, %v1665_v38  ;;  %v1664_v11 = vadd.f32 %v1601_v18, %v5676_v45 }
 0x16f   : > { %v4100_v2 = vpop.f32.mrf.mxu1  ;;  %v1883_v20 = vpop.f32.mrf.mxu0 }
 0x170   : > { %6374 = vst [vmem:[#allocation20_spill] sm:$0xff] %v5783_v17  ;;  %v5786_v23 = vadd.f32 %v1873_v52, %v1664_v11  ;;  %v1667_v21 = vadd.f32 %v4100_v2, %v5683_v44 }
 0x171   : > { %v1611_v59 = vpop.f32.mrf.mxu1  ;;  %v4153_v55 = vpop.f32.mrf.mxu0 }
 0x172   : > { %6375 = vst [vmem:[#allocation22_spill] sm:$0xff] %v5786_v23  ;;  %v5789_v58 = vadd.f32 %v4150_v14, %v1667_v21  ;;  %v1666_v54 = vadd.f32 %v1611_v59, %v5692_v27 }
 0x173   : > { %v4103_v0 = vpop.f32.mrf.mxu1  ;;  %v1893_v42 = vpop.f32.mrf.mxu0 }
 0x174   : > { %6376 = vst [vmem:[#allocation24_spill] sm:$0xff] %v5789_v58  ;;  %v5792_v16 = vadd.f32 %v1883_v20, %v1666_v54  ;;  %v1669_v29 = vadd.f32 %v4103_v0, %v5697_v37 }
 0x175   : > { %v1621_v45 = vpop.f32.mrf.mxu1  ;;  %v4156_v60 = vpop.f32.mrf.mxu0 }
 0x176   : > { %6377 = vst [vmem:[#allocation26_spill] sm:$0xff] %v5792_v16  ;;  %v5795_v31 = vadd.f32 %v4153_v55, %v1669_v29  ;;  %v1668_v62 = vadd.f32 %v1621_v45, %v5702_v35 }
 0x177   : > { %v4106_v44 = vpop.f32.mrf.mxu1  ;;  %v1903_v51 = vpop.f32.mrf.mxu0 }
 0x178   : > { %6378 = vst [vmem:[#allocation28_spill] sm:$0xff] %v5795_v31  ;;  %v5798_v7 = vadd.f32 %v1893_v42, %v1668_v62  ;;  %v1671_v19 = vadd.f32 %v4106_v44, %v5705_v9 }
 0x179   : > { %v1631_v27 = vpop.f32.mrf.mxu1  ;;  %v5804_v47 = vpop.f32.mrf.mxu0 }
 0x17a   : > { %6379 = vst [vmem:[#allocation30_spill] sm:$0xff] %v5798_v7  ;;  %v5801_v3 = vadd.f32 %v4156_v60, %v1671_v19  ;;  %v1670_v63 = vadd.f32 %v1631_v27, %v5708_v22 }
 0x17b   : > { %v4161_v37 = vpop.f32.mrf.mxu1  ;;  %v5808_v40 = vpop.f32.mrf.mxu0 }
 0x17c   : > { %6380 = vst [vmem:[#allocation2_spill] sm:$0xff] %v5801_v3  ;;  %v5806_v33 = vadd.f32 %v1903_v51, %v1670_v63 }
 0x17d   : > { %v2024_v35 = vpop.f32.mrf.mxu1  ;;  %v5810_v32 = vpop.f32.mrf.mxu0 }
 0x17e   : > { %6381 = vst [vmem:[#allocation3_spill] sm:$0xff] %v5806_v33 }
 0x17f   : > { %v4164_v26 = vpop.f32.mrf.mxu1  ;;  %v5812_v4 = vpop.f32.mrf.mxu0 }
 0x181   : > { %v5814_v9 = vpop.f32.mrf.mxu1  ;;  %v5816_v13 = vpop.f32.mrf.mxu0 }
 0x183   : > { %v5818_v38 = vpop.f32.mrf.mxu1  ;;  %v5820_v22 = vpop.f32.mrf.mxu0 }
 0x185   : > { %v5822_v52 = vpop.f32.mrf.mxu1  ;;  %v5824_v18 = vpop.f32.mrf.mxu0 }
 0x187   : > { %v5826_v11 = vpop.f32.mrf.mxu1  ;;  %v5828_v14 = vpop.f32.mrf.mxu0 }
 0x189   : > { %v5830_v2 = vpop.f32.mrf.mxu1  ;;  %v5832_v21 = vpop.f32.mrf.mxu0 }
 0x18b   : > { %v5834_v20 = vpop.f32.mrf.mxu1  ;;  %v5836_v59 = vpop.f32.mrf.mxu0 }
 0x18d   : > { %v5838_v54 = vpop.f32.mrf.mxu1  ;;  %v5840_v55 = vpop.f32.mrf.mxu0 }
 0x18f   : > { %v5842_v0 = vpop.f32.mrf.mxu1  ;;  %v5844_v29 = vpop.f32.mrf.mxu0 }
 0x191   : > { %v5846_v42 = vpop.f32.mrf.mxu1  ;;  %v5848_v45 = vpop.f32.mrf.mxu0 }
 0x193   : > { %v5850_v62 = vpop.f32.mrf.mxu1  ;;  %v5852_v60 = vpop.f32.mrf.mxu0 }
 0x195   : > { %v5854_v44 = vpop.f32.mrf.mxu1  ;;  %v5856_v19 = vpop.f32.mrf.mxu0 }
 0x197   : > { %v5858_v51 = vpop.f32.mrf.mxu1  ;;  %v5860_v27 = vpop.f32.mrf.mxu0 }
 0x199   : > { %v5862_v63 = vpop.f32.mrf.mxu1  ;;  %v5864_v33 = vpop.f32.mrf.mxu0 }
 0x19b   : > { %v5866_v3 = vpop.f32.mrf.mxu1  ;;  %v5868_v7 = vpop.f32.mrf.mxu0 }
 0x19c   : > { %6382 = vst [vmem:[#allocation5_spill] sm:$0xff] %v5868_v7 }
 0x19d   : > { %v5870_v31 = vpop.f32.mrf.mxu1  ;;  %v5872_v16 = vpop.f32.mrf.mxu0 }
 0x19e   : > { %6383 = vst [vmem:[#allocation7_spill] sm:$0xff] %v5872_v16 }
 0x19f   : > { %v5874_v58 = vpop.f32.mrf.mxu1  ;;  %v5876_v23 = vpop.f32.mrf.mxu0 }
 0x1a0   : > { %6384 = vst [vmem:[#allocation9_spill] sm:$0xff] %v5874_v58  ;;  %6385 = vst [vmem:[#allocation11_spill] sm:$0xff] %v5876_v23 }
 0x1a1   : > { %v5878_v17 = vpop.f32.mrf.mxu1  ;;  %v5880_v24 = vpop.f32.mrf.mxu0 }
 0x1a2   : > { %6386 = vst [vmem:[#allocation13_spill] sm:$0xff] %v5878_v17  ;;  %6387 = vst [vmem:[#allocation15_spill] sm:$0xff] %v5880_v24 }
 0x1a3   : > { %v5882_v56 = vpop.f32.mrf.mxu1  ;;  %v5884_v46 = vpop.f32.mrf.mxu0 }
 0x1a4   : > { %6388 = vst [vmem:[#allocation17_spill] sm:$0xff] %v5882_v56  ;;  %6389 = vst [vmem:[#allocation19_spill] sm:$0xff] %v5884_v46 }
 0x1a5   : > { %v5886_v1 = vpop.f32.mrf.mxu1  ;;  %v5888_v28 = vpop.f32.mrf.mxu0 }
 0x1a6   : > { %6390 = vst [vmem:[#allocation21_spill] sm:$0xff] %v5886_v1  ;;  %6391 = vst [vmem:[#allocation23_spill] sm:$0xff] %v5888_v28 }
 0x1a7   : > { %v5890_v7 = vpop.f32.mrf.mxu1  ;;  %v5892_v48 = vpop.f32.mrf.mxu0 }
 0x1a8   : > { %6392 = vst [vmem:[#allocation25_spill] sm:$0xff] %v5890_v7  ;;  %6393 = vst [vmem:[#allocation8_spill] sm:$0xff] %v5892_v48 }
 0x1a9   : > { %v5894_v16 = vpop.f32.mrf.mxu1  ;;  %v5896_v58 = vpop.f32.mrf.mxu0 }
 0x1aa   : > { %6394 = vst [vmem:[#allocation29_spill] sm:$0xff] %v5894_v16  ;;  %6395 = vst [vmem:[#allocation10_spill] sm:$0xff] %v5896_v58 }
 0x1ab   : > { %v5898_v23 = vpop.f32.mrf.mxu1  ;;  %v5900_v17 = vpop.f32.mrf.mxu0 }
 0x1ac   : > { %6396 = vst [vmem:[#allocation31_spill] sm:$0xff] %v5898_v23  ;;  %6397 = vst [vmem:[#allocation33_spill] sm:$0xff] %v5900_v17  ;;  %v2184_v17 = vadd.f32 %v4161_v37, %v5711_v12 }
 0x1ad   : > { %v5902_v24 = vpop.f32.mrf.mxu1  ;;  %v5904_v56 = vpop.f32.mrf.mxu0 }
 0x1ae   : > { %6398 = vst [vmem:[#allocation27_spill] sm:$0xff] %v5902_v24  ;;  %6399 = vst [vmem:[#allocation4_spill] sm:$0xff] %v5904_v56  ;;  %v2183_v56 = vadd.f32 %v2024_v35, %v5714_v15  ;;  %v2188_v15 = vadd.f32 %v5818_v38, %v5723_v41  ;;  %v2187_v35 = vadd.f32 %v5822_v52, %v5726_v49 }
 0x1af   : > { %v5906_v46 = vpop.f32.mrf.mxu1  ;;  %v5908_v1 = vpop.f32.mrf.mxu0 }
 0x1b0   : > { %6400 = vst [vmem:[#allocation32_spill] sm:$0xff] %v5906_v46  ;;  %6401 = vst [vmem:[#allocation35_spill] sm:$0xff] %v5908_v1  ;;  %v2456_v52 = vadd.f32 %v5816_v13, %v2188_v15  ;;  %v2192_v13 = vadd.f32 %v5834_v20, %v5735_v34 }
 0x1b1   : > { %v5910_v28 = vpop.f32.mrf.mxu1  ;;  %v5912_v7 = vpop.f32.mrf.mxu0 }
 0x1b2   : > { %6402 = vst [vmem:[#allocation6_spill] sm:$0xff] %v5910_v28  ;;  %6403 = vst [vmem:[#allocation34_spill] sm:$0xff] %v5912_v7  ;;  %v2452_v7 = vadd.f32 %v5804_v47, %v2184_v17 }
 0x1b3   : > { %v5914_v48 = vpop.f32.mrf.mxu1  ;;  %v5916_v16 = vpop.f32.mrf.mxu0 }
 0x1b4   : > { %6404 = vst [vmem:[#allocation36_spill] sm:$0xff] %v5914_v48  ;;  %6405 = vst [vmem:[#allocation37_spill] sm:$0xff] %v5916_v16  ;;  %v2186_v48 = vadd.f32 %v4164_v26, %v5717_v43  ;;  %v5942_v43 = vld [vmem:[%s6133_s2] ss:$0 sm:$0xff] }
 0x1b5   : > { %v5918_v58 = vpop.f32.mrf.mxu1  ;;  %v5921_v23 = vpop.f32.mrf.mxu0 }
 0x1b6   : > { %6406 = vst [vmem:[#allocation38_spill] sm:$0xff] %v5918_v58  ;;  %6407 = vst [vmem:[#allocation41_spill] sm:$0xff] %v5921_v23  ;;  %v2451_v58 = vadd.f32 %v5808_v40, %v2183_v56  ;;  %v2185_v23 = vadd.f32 %v5814_v9, %v5720_v10  ;;  %v2454_v47 = vadd.f32 %v5810_v32, %v2186_v48 }
 0x1b7   : > { %v5923_v24 = vpop.f32.mrf.mxu1  ;;  %v5926_v46 = vpop.f32.mrf.mxu0  ;;  %v2190_v10 = vadd.f32 %v5826_v11, %v5729_v6 }
 0x1b8   : > { %6408 = vst [vmem:[#allocation42_spill] sm:$0xff] %v5926_v46  ;;  %v2453_v38 = vadd.f32 %v5812_v4, %v2185_v23  ;;  %v2455_v46 = vadd.f32 %v5820_v22, %v2187_v35  ;;  %v2189_v4 = vadd.f32 %v5830_v2, %v5732_v53 }
 0x1b9   : > { %v5928_v1 = vpop.f32.mrf.mxu1  ;;  %v4311_v16 = vpop.f32.mrf.mxu0  ;;  %v2458_v23 = vadd.f32 %v5824_v18, %v2190_v10  ;;  %v2194_v18 = vadd.f32 %v5842_v0, %v5741_v39  ;;  %v2193_v10 = vadd.f32 %v5846_v42, %v5744_v57  ;;  %v2460_v0 = vadd.f32 %v5832_v21, %v2192_v13 }
 0x1ba   : > { %v2196_v13 = vadd.f32 %v5850_v62, %v5747_v5  ;;  %v2197_v5 = vadd.f32 %v5862_v63, %v5756_v8 }
 0x1bb   : > { %v4261_v28 = vpop.f32.mrf.mxu1  ;;  %v2835_v37 = vpop.f32.mrf.mxu0 }
 0x1bc   : > { %v2724_v12 = vadd.f32 %v4261_v28, %v2452_v7 }
 0x1bd   : > { %v2564_v17 = vpop.f32.mrf.mxu1  ;;  %v4314_v7 = vpop.f32.mrf.mxu0 }
 0x1be   : > { %v2995_v56 = vadd.f32 %v4311_v16, %v2724_v12  ;;  %v2723_v28 = vadd.f32 %v2564_v17, %v2451_v58  ;;  %v2191_v17 = vadd.f32 %v5838_v54, %v5738_v61 }
 0x1bf   : > { %v4264_v40 = vpop.f32.mrf.mxu1  ;;  %v2845_v9 = vpop.f32.mrf.mxu0 }
 0x1c0   : > { %v3034_v41 = vadd.f32 %v5942_v43, %v2995_v56  ;;  %v2994_v26 = vadd.f32 %v2835_v37, %v2723_v28  ;;  %v2726_v49 = vadd.f32 %v4264_v40, %v2454_v47 }
 0x1c1   : > { %v2574_v48 = vpop.f32.mrf.mxu1  ;;  %v4317_v32 = vpop.f32.mrf.mxu0 }
 0x1c2   : > { %vm3066_vm5 = vcmp.gt.f32.partialorder %v3034_v41, 0.0  ;;  %v3098_v6 = vmul.f32 0.1, %v3034_v41  ;;  %v3033_v58 = vadd.f32 %v5942_v43, %v2994_v26  ;;  %v2997_v16 = vadd.f32 %v4314_v7, %v2726_v49 }
 0x1c3   : > { %v2725_v22 = vadd.f32 %v2574_v48, %v2453_v38  ;;  %v4267_v11 = vpop.f32.mrf.mxu1  ;;  %v2855_v35 = vpop.f32.mrf.mxu0  ;;  %v2457_v7 = vadd.f32 %v5828_v14, %v2189_v4 }
 0x1c4   : > { %v3130_v12 = vsel %vm3066_vm5, %v3034_v41, %v3098_v6  ;;  %vm3065_vm6 = vcmp.gt.f32.partialorder %v3033_v58, 0.0  ;;  %v3097_v37 = vmul.f32 0.1, %v3033_v58  ;;  %v3036_v15 = vadd.f32 %v5942_v43, %v2997_v16 }
 0x1c5   : > { %3163 = vst.msk [vmem:[%s5955_s16 + $0x8] sm:$0xff] %vm3161_vm4, %v3130_v12  ;;  %v2996_v53 = vadd.f32 %v2845_v9, %v2725_v22  ;;  %v2728_v2 = vadd.f32 %v4267_v11, %v2456_v52  ;;  %v2584_v34 = vpop.f32.mrf.mxu1  ;;  %v4320_v28 = vpop.f32.mrf.mxu0  ;;  %v2462_v9 = vadd.f32 %v5840_v55, %v2194_v18  ;;  %v2461_v6 = vadd.f32 %v5844_v29, %v2193_v10 }
 0x1c6   : > { %v3129_v20 = vsel %vm3065_vm6, %v3033_v58, %v3097_v37  ;;  %vm3068_vm7 = vcmp.gt.f32.partialorder %v3036_v15, 0.0  ;;  %v3100_v47 = vmul.f32 0.1, %v3036_v15  ;;  %v2727_v56 = vadd.f32 %v2584_v34, %v2455_v46 }
 0x1c7   : > { %3162 = vst.msk [vmem:[%s5955_s16] sm:$0xff] %vm3161_vm4, %v3129_v20  ;;  %v3035_v61 = vadd.f32 %v5942_v43, %v2996_v53  ;;  %v2999_v39 = vadd.f32 %v4317_v32, %v2728_v2  ;;  %v4270_v54 = vpop.f32.mrf.mxu1  ;;  %v2865_v49 = vpop.f32.mrf.mxu0  ;;  %v2459_v46 = vadd.f32 %v5836_v59, %v2191_v17  ;;  %v2195_v29 = vadd.f32 %v5854_v44, %v5750_v30 }
 0x1c8   : > { %v3132_v40 = vsel %vm3068_vm7, %v3036_v15, %v3100_v47  ;;  %v2998_v41 = vadd.f32 %v2855_v35, %v2727_v56  ;;  %v2730_v26 = vadd.f32 %v4270_v54, %v2458_v23  ;;  %v2198_v18 = vadd.f32 %v5858_v51, %v5753_v36 }
 0x1c9   : > { %3165 = vst.msk [vmem:[%s5955_s16 + $0x18] sm:$0xff] %vm3161_vm4, %v3132_v40  ;;  %vm3067_vm8 = vcmp.gt.f32.partialorder %v3035_v61, 0.0  ;;  %v3099_v14 = vmul.f32 0.1, %v3035_v61  ;;  %v3038_v57 = vadd.f32 %v5942_v43, %v2999_v39  ;;  %v2594_v42 = vpop.f32.mrf.mxu1  ;;  %v4323_v48 = vpop.f32.mrf.mxu0  ;;  %v2464_v47 = vadd.f32 %v5848_v45, %v2196_v13  ;;  %v6413_v13 = vld [vmem:[#allocation12_spill] sm:$0xff] }
 0x1ca   : > { %v3037_v38 = vadd.f32 %v5942_v43, %v2998_v41  ;;  %v3001_v52 = vadd.f32 %v4320_v28, %v2730_v26  ;;  %v2729_v21 = vadd.f32 %v2594_v42, %v2457_v7  ;;  %v2200_v56 = vadd.f32 %v5866_v3, %v5759_v50 }
 0x1cb   : > { %v3131_v58 = vsel %vm3067_vm8, %v3035_v61, %v3099_v14  ;;  %vm3070_vm9 = vcmp.gt.f32.partialorder %v3038_v57, 0.0  ;;  %v3102_v59 = vmul.f32 0.1, %v3038_v57  ;;  %v4273_v16 = vpop.f32.mrf.mxu1  ;;  %v2875_v4 = vpop.f32.mrf.mxu0  ;;  %v2463_v63 = vadd.f32 %v5852_v60, %v2195_v29 }
 0x1cc   : > { %3164 = vst.msk [vmem:[%s5955_s16 + $0x10] sm:$0xff] %vm3161_vm4, %v3131_v58  ;;  %vm3069_vm10 = vcmp.gt.f32.partialorder %v3037_v38, 0.0  ;;  %v3101_v32 = vmul.f32 0.1, %v3037_v38  ;;  %v3040_v23 = vadd.f32 %v5942_v43, %v3001_v52  ;;  %v3000_v55 = vadd.f32 %v2865_v49, %v2729_v21  ;;  %v6410_v52 = vld [vmem:[#allocation9_spill] sm:$0xff] }
 0x1cd   : > { %v3134_v22 = vsel %vm3070_vm9, %v3038_v57, %v3102_v59  ;;  %v2732_v11 = vadd.f32 %v4273_v16, %v2460_v0  ;;  %v2604_v12 = vpop.f32.mrf.mxu1  ;;  %v4326_v17 = vpop.f32.mrf.mxu0  ;;  %v2466_v39 = vadd.f32 %v5856_v19, %v2198_v18  ;;  %v2465_v54 = vadd.f32 %v5860_v27, %v2197_v5 }
 0x1ce   : > { %3167 = vst.msk [vmem:[%s5955_s16 + $0x28] sm:$0xff] %vm3161_vm4, %v3134_v22  ;;  %v3133_v37 = vsel %vm3069_vm10, %v3037_v38, %v3101_v32  ;;  %vm3072_vm11 = vcmp.gt.f32.partialorder %v3040_v23, 0.0  ;;  %v3104_v15 = vmul.f32 0.1, %v3040_v23  ;;  %v3039_v35 = vadd.f32 %v5942_v43, %v3000_v55  ;;  %v6409_v38 = vld [vmem:[#allocation39_spill] sm:$0xff]  ;;  %v6412_v55 = vld [vmem:[#allocation13_spill] sm:$0xff] }
 0x1cf   : > { %3166 = vst.msk [vmem:[%s5955_s16 + $0x20] sm:$0xff] %vm3161_vm4, %v3133_v37  ;;  %v3003_v30 = vadd.f32 %v4323_v48, %v2732_v11  ;;  %v2731_v62 = vadd.f32 %v2604_v12, %v2459_v46  ;;  %v4276_v44 = vpop.f32.mrf.mxu1  ;;  %v2885_v20 = vpop.f32.mrf.mxu0  ;;  %v2468_v26 = vadd.f32 %v5864_v33, %v2200_v56  ;;  %v2202_v33 = vadd.f32 %v6410_v52, %v6409_v38  ;;  %v6417_v56 = vld [vmem:[#allocation11_spill] sm:$0xff] }
 0x1d0   : > { %v3136_v53 = vsel %vm3072_vm11, %v3040_v23, %v3104_v15  ;;  %vm3071_vm12 = vcmp.gt.f32.partialorder %v3039_v35, 0.0  ;;  %v3103_v2 = vmul.f32 0.1, %v3039_v35  ;;  %v2734_v34 = vadd.f32 %v4276_v44, %v2462_v9  ;;  %v6411_v23 = vld [vmem:[#allocation40_spill] sm:$0xff]  ;;  %v6416_v44 = vld [vmem:[#allocation7_spill] sm:$0xff] }
 0x1d1   : > { %3169 = vst.msk [vmem:[%s5955_s16 + $0x38] sm:$0xff] %vm3161_vm4, %v3136_v53  ;;  %v3042_v36 = vadd.f32 %v5942_v43, %v3003_v30  ;;  %v3002_v8 = vadd.f32 %v2875_v4, %v2731_v62  ;;  %v2614_v51 = vpop.f32.mrf.mxu1  ;;  %v4329_v61 = vpop.f32.mrf.mxu0  ;;  %v2199_v9 = vadd.f32 %v5870_v31, %v5762_v25  ;;  %v2201_v4 = vadd.f32 %v6412_v55, %v6411_v23  ;;  %v6414_v25 = vld [vmem:[#allocation17_spill] sm:$0xff]  ;;  %v6427_v23 = vld [vmem:[#allocation31_spill] sm:$0xff] }
 0x1d2   : > { %v3135_v28 = vsel %vm3071_vm12, %v3039_v35, %v3103_v2  ;;  %v3005_v7 = vadd.f32 %v4326_v17, %v2734_v34  ;;  %v2733_v10 = vadd.f32 %v2614_v51, %v2461_v6  ;;  %v2204_v31 = vadd.f32 %v6414_v25, %v6413_v13  ;;  %v6415_v17 = vld [vmem:[#allocation5_spill] sm:$0xff] }
 0x1d3   : > { %3168 = vst.msk [vmem:[%s5955_s16 + $0x30] sm:$0xff] %vm3161_vm4, %v3135_v28  ;;  %vm3074_vm13 = vcmp.gt.f32.partialorder %v3042_v36, 0.0  ;;  %v3106_v45 = vmul.f32 0.1, %v3042_v36  ;;  %v3041_v50 = vadd.f32 %v5942_v43, %v3002_v8  ;;  %v4279_v3 = vpop.f32.mrf.mxu1  ;;  %v2895_v41 = vpop.f32.mrf.mxu0  ;;  %v2467_v18 = vadd.f32 %v6415_v17, %v2199_v9  ;;  %v6418_v28 = vld [vmem:[#allocation15_spill] sm:$0xff] }
 0x1d4   : > { %v3044_v0 = vadd.f32 %v5942_v43, %v3005_v7  ;;  %v3004_v40 = vadd.f32 %v2885_v20, %v2733_v10  ;;  %v2736_v60 = vadd.f32 %v4279_v3, %v2464_v47  ;;  %v2470_v53 = vadd.f32 %v6416_v44, %v2202_v33  ;;  %v6420_v3 = vld [vmem:[#allocation21_spill] sm:$0xff] }
 0x1d5   : > { %v3138_v49 = vsel %vm3074_vm13, %v3042_v36, %v3106_v45  ;;  %vm3073_vm14 = vcmp.gt.f32.partialorder %v3041_v50, 0.0  ;;  %v3105_v19 = vmul.f32 0.1, %v3041_v50  ;;  %v2624_v46 = vpop.f32.mrf.mxu1  ;;  %v4332_v42 = vpop.f32.mrf.mxu0  ;;  %v2469_v36 = vadd.f32 %v6417_v56, %v2201_v4 }
 0x1d6   : > { %3171 = vst.msk [vmem:[%s5955_s16 + $0x48] sm:$0xff] %vm3161_vm4, %v3138_v49  ;;  %vm3076_vm15 = vcmp.gt.f32.partialorder %v3044_v0, 0.0  ;;  %v3108_v14 = vmul.f32 0.1, %v3044_v0  ;;  %v3043_v57 = vadd.f32 %v5942_v43, %v3004_v40  ;;  %v3007_v27 = vadd.f32 %v4329_v61, %v2736_v60 }
 0x1d7   : > { %v3137_v21 = vsel %vm3073_vm14, %v3041_v50, %v3105_v19  ;;  %v2735_v48 = vadd.f32 %v2624_v46, %v2463_v63  ;;  %v4282_v6 = vpop.f32.mrf.mxu1  ;;  %v2905_v32 = vpop.f32.mrf.mxu0  ;;  %v2472_v7 = vadd.f32 %v6418_v28, %v2204_v31  ;;  %v6419_v50 = vld [vmem:[#allocation14_spill] sm:$0xff]  ;;  %v6421_v46 = vld [vmem:[#allocation16_spill] sm:$0xff] }
 0x1d8   : > { %3170 = vst.msk [vmem:[%s5955_s16 + $0x40] sm:$0xff] %vm3161_vm4, %v3137_v21  ;;  %v3140_v58 = vsel %vm3076_vm15, %v3044_v0, %v3108_v14  ;;  %vm3075_vm0 = vcmp.gt.f32.partialorder %v3043_v57, 0.0  ;;  %v3107_v59 = vmul.f32 0.1, %v3043_v57  ;;  %v3046_v16 = vadd.f32 %v5942_v43, %v3007_v27  ;;  %v6422_v14 = vld [vmem:[#allocation25_spill] sm:$0xff]  ;;  %v6423_v27 = vld [vmem:[#allocation18_spill] sm:$0xff] }
 0x1d9   : > { %3173 = vst.msk [vmem:[%s5955_s16 + $0x58] sm:$0xff] %vm3161_vm4, %v3140_v58  ;;  %v3006_v29 = vadd.f32 %v2895_v41, %v2735_v48  ;;  %v2738_v22 = vadd.f32 %v4282_v6, %v2466_v39  ;;  %v2634_v11 = vpop.f32.mrf.mxu1  ;;  %v4335_v35 = vpop.f32.mrf.mxu0 }
 0x1da   : > { %v3139_v12 = vsel %vm3075_vm0, %v3043_v57, %v3107_v59  ;;  %vm3078_vm1 = vcmp.gt.f32.partialorder %v3046_v16, 0.0  ;;  %v3110_v37 = vmul.f32 0.1, %v3046_v16  ;;  %v2737_v15 = vadd.f32 %v2634_v11, %v2465_v54  ;;  %v6425_v59 = vld [vmem:[#allocation19_spill] sm:$0xff] }
 0x1db   : > { %3172 = vst.msk [vmem:[%s5955_s16 + $0x50] sm:$0xff] %vm3161_vm4, %v3139_v12  ;;  %v3045_v5 = vadd.f32 %v5942_v43, %v3006_v29  ;;  %v3009_v30 = vadd.f32 %v4332_v42, %v2738_v22  ;;  %v4285_v62 = vpop.f32.mrf.mxu1  ;;  %v2915_v47 = vpop.f32.mrf.mxu0  ;;  %v2203_v54 = vadd.f32 %v6420_v3, %v6419_v50  ;;  %v2206_v57 = vadd.f32 %v6422_v14, %v6421_v46  ;;  %v6424_v42 = vld [vmem:[#allocation29_spill] sm:$0xff]  ;;  %v6428_v12 = vld [vmem:[#allocation23_spill] sm:$0xff]  ;;  %v6437_v46 = vld [vmem:[#allocation6_spill] sm:$0xff] }
 0x1dc   : > { %v3142_v2 = vsel %vm3078_vm1, %v3046_v16, %v3110_v37  ;;  %v3008_v34 = vadd.f32 %v2905_v32, %v2737_v15  ;;  %v2740_v20 = vadd.f32 %v4285_v62, %v2468_v26  ;;  %v2205_v9 = vadd.f32 %v6424_v42, %v6423_v27  ;;  %v6426_v32 = vld [vmem:[#allocation20_spill] sm:$0xff] }
 0x1dd   : > { %3175 = vst.msk [vmem:[%s5955_s16 + $0x68] sm:$0xff] %vm3161_vm4, %v3142_v2  ;;  %vm3077_vm2 = vcmp.gt.f32.partialorder %v3045_v5, 0.0  ;;  %v3109_v8 = vmul.f32 0.1, %v3045_v5  ;;  %v3048_v51 = vadd.f32 %v5942_v43, %v3009_v30  ;;  %v2644_v63 = vpop.f32.mrf.mxu1  ;;  %v4338_v45 = vpop.f32.mrf.mxu0  ;;  %v2471_v16 = vadd.f32 %v6425_v59, %v2203_v54  ;;  %v6430_v2 = vld [vmem:[#allocation22_spill] sm:$0xff] }
 0x1de   : > { %v3047_v10 = vadd.f32 %v5942_v43, %v3008_v34  ;;  %v3011_v61 = vadd.f32 %v4335_v35, %v2740_v20  ;;  %v2739_v39 = vadd.f32 %v2644_v63, %v2467_v18  ;;  %v2208_v55 = vadd.f32 %v6427_v23, %v6426_v32  ;;  %v6429_v18 = vld [vmem:[#allocation8_spill] sm:$0xff]  ;;  %v6431_v34 = vld [vmem:[#allocation27_spill] sm:$0xff] }
 0x1df   : > { %v3141_v0 = vsel %vm3077_vm2, %v3045_v5, %v3109_v8  ;;  %vm3080_vm3 = vcmp.gt.f32.partialorder %v3048_v51, 0.0  ;;  %v3112_v40 = vmul.f32 0.1, %v3048_v51  ;;  %v4288_v60 = vpop.f32.mrf.mxu1  ;;  %v2925_v19 = vpop.f32.mrf.mxu0  ;;  %v2474_v37 = vadd.f32 %v6428_v12, %v2206_v57  ;;  %v6432_v8 = vld [vmem:[#allocation10_spill] sm:$0xff] }
 0x1e0   : > { %3174 = vst.msk [vmem:[%s5955_s16 + $0x60] sm:$0xff] %vm3161_vm4, %v3141_v0  ;;  %vm3079_vm5 = vcmp.gt.f32.partialorder %v3047_v10, 0.0  ;;  %v3111_v41 = vmul.f32 0.1, %v3047_v10  ;;  %v3050_v26 = vadd.f32 %v5942_v43, %v3011_v61  ;;  %v3010_v49 = vadd.f32 %v2915_v47, %v2739_v39  ;;  %v6433_v61 = vld [vmem:[#allocation24_spill] sm:$0xff] }
 0x1e1   : > { %v3144_v38 = vsel %vm3080_vm3, %v3048_v51, %v3112_v40  ;;  %v2742_v52 = vadd.f32 %v4288_v60, %v2470_v53  ;;  %v2654_v33 = vpop.f32.mrf.mxu1  ;;  %v4341_v58 = vpop.f32.mrf.mxu0  ;;  %v2473_v5 = vadd.f32 %v6429_v18, %v2205_v9  ;;  %v2207_v20 = vadd.f32 %v6431_v34, %v6430_v2  ;;  %v6434_v39 = vld [vmem:[#allocation32_spill] sm:$0xff] }
 0x1e2   : > { %3177 = vst.msk [vmem:[%s5955_s16 + $0x78] sm:$0xff] %vm3161_vm4, %v3144_v38  ;;  %v3143_v21 = vsel %vm3079_vm5, %v3047_v10, %v3111_v41  ;;  %vm3082_vm6 = vcmp.gt.f32.partialorder %v3050_v26, 0.0  ;;  %v3114_v48 = vmul.f32 0.1, %v3050_v26  ;;  %v3049_v6 = vadd.f32 %v5942_v43, %v3010_v49 }
 0x1e3   : > { %3176 = vst.msk [vmem:[%s5955_s16 + $0x70] sm:$0xff] %vm3161_vm4, %v3143_v21  ;;  %v3013_v4 = vadd.f32 %v4338_v45, %v2742_v52  ;;  %v2741_v13 = vadd.f32 %v2654_v33, %v2469_v36  ;;  %v4291_v25 = vpop.f32.mrf.mxu1  ;;  %v2935_v11 = vpop.f32.mrf.mxu0  ;;  %v2476_v51 = vadd.f32 %v6432_v8, %v2208_v55  ;;  %v2210_v45 = vadd.f32 %v6434_v39, %v6433_v61  ;;  %v6438_v21 = vld [vmem:[#allocation4_spill] sm:$0xff] }
 0x1e4   : > { %v3146_v31 = vsel %vm3082_vm6, %v3050_v26, %v3114_v48  ;;  %vm3081_vm7 = vcmp.gt.f32.partialorder %v3049_v6, 0.0  ;;  %v3113_v29 = vmul.f32 0.1, %v3049_v6  ;;  %v2744_v22 = vadd.f32 %v4291_v25, %v2472_v7  ;;  %v6435_v26 = vld [vmem:[#allocation33_spill] sm:$0xff] }
 0x1e5   : > { %3179 = vst.msk [vmem:[%s5955_s16 + $0x88] sm:$0xff] %vm3161_vm4, %v3146_v31  ;;  %v3052_v15 = vadd.f32 %v5942_v43, %v3013_v4  ;;  %v3012_v35 = vadd.f32 %v2925_v19, %v2741_v13  ;;  %v2664_v17 = vpop.f32.mrf.mxu1  ;;  %v4344_v53 = vpop.f32.mrf.mxu0  ;;  %v2475_v49 = vadd.f32 %v6435_v26, %v2207_v20  ;;  %v6436_v19 = vld [vmem:[#allocation26_spill] sm:$0xff]  ;;  %v2478_v48 = vadd.f32 %v6438_v21, %v2210_v45  ;;  %v6441_v31 = vld [vmem:[#allocation35_spill] sm:$0xff] }
 0x1e6   : > { %v3145_v30 = vsel %vm3081_vm7, %v3049_v6, %v3113_v29  ;;  %v3015_v62 = vadd.f32 %v4341_v58, %v2744_v22  ;;  %v2743_v44 = vadd.f32 %v2664_v17, %v2471_v16  ;;  %v2209_v14 = vadd.f32 %v6437_v46, %v6436_v19  ;;  %v6439_v6 = vld [vmem:[#allocation28_spill] sm:$0xff]  ;;  %v6445_v20 = vld [vmem:[#allocation34_spill] sm:$0xff] }
 0x1e7   : > { %3178 = vst.msk [vmem:[%s5955_s16 + $0x80] sm:$0xff] %vm3161_vm4, %v3145_v30  ;;  %vm3084_vm8 = vcmp.gt.f32.partialorder %v3052_v15, 0.0  ;;  %v3116_v47 = vmul.f32 0.1, %v3052_v15  ;;  %v3051_v56 = vadd.f32 %v5942_v43, %v3012_v35  ;;  %v4294_v36 = vpop.f32.mrf.mxu1  ;;  %v2945_v10 = vpop.f32.mrf.mxu0  ;;  %v6440_v58 = vld [vmem:[#allocation36_spill] sm:$0xff]  ;;  %v6449_v46 = vld [vmem:[#allocation42_spill] sm:$0xff] }
 0x1e8   : > { %v3054_v63 = vadd.f32 %v5942_v43, %v3015_v62  ;;  %v3014_v28 = vadd.f32 %v2935_v11, %v2743_v44  ;;  %v2746_v7 = vadd.f32 %v4294_v36, %v2474_v37  ;;  %v2212_v59 = vadd.f32 %v6440_v58, %v6439_v6  ;;  %v6442_v37 = vld [vmem:[#allocation30_spill] sm:$0xff] }
 0x1e9   : > { %v3148_v50 = vsel %vm3084_vm8, %v3052_v15, %v3116_v47  ;;  %vm3083_vm9 = vcmp.gt.f32.partialorder %v3051_v56, 0.0  ;;  %v3115_v3 = vmul.f32 0.1, %v3051_v56  ;;  %v2674_v54 = vpop.f32.mrf.mxu1  ;;  %v4347_v41 = vpop.f32.mrf.mxu0  ;;  %v2477_v29 = vadd.f32 %v6441_v31, %v2209_v14  ;;  %v6443_v15 = vld [vmem:[#allocation38_spill] sm:$0xff] }
 0x1ea   : > { %3181 = vst.msk [vmem:[%s5955_s16 + $0x98] sm:$0xff] %vm3161_vm4, %v3148_v50  ;;  %vm3086_vm10 = vcmp.gt.f32.partialorder %v3054_v63, 0.0  ;;  %v3118_v0 = vmul.f32 0.1, %v3054_v63  ;;  %v3053_v40 = vadd.f32 %v5942_v43, %v3014_v28  ;;  %v3017_v60 = vadd.f32 %v4344_v53, %v2746_v7  ;;  %v6444_v62 = vld [vmem:[#allocation2_spill] sm:$0xff] }
 0x1eb   : > { %v3147_v57 = vsel %vm3083_vm9, %v3051_v56, %v3115_v3  ;;  %v2745_v27 = vadd.f32 %v2674_v54, %v2473_v5  ;;  %v4297_v42 = vpop.f32.mrf.mxu1  ;;  %v2955_v33 = vpop.f32.mrf.mxu0  ;;  %v2211_v35 = vadd.f32 %v6443_v15, %v6442_v37  ;;  %v2214_v44 = vadd.f32 %v5923_v24, %v6444_v62  ;;  %v6447_v3 = vld [vmem:[#allocation37_spill] sm:$0xff] }
 0x1ec   : > { %3180 = vst.msk [vmem:[%s5955_s16 + $0x90] sm:$0xff] %vm3161_vm4, %v3147_v57  ;;  %v3150_v9 = vsel %vm3086_vm10, %v3054_v63, %v3118_v0  ;;  %vm3085_vm11 = vcmp.gt.f32.partialorder %v3053_v40, 0.0  ;;  %v3117_v38 = vmul.f32 0.1, %v3053_v40  ;;  %v3056_v52 = vadd.f32 %v5942_v43, %v3017_v60  ;;  %v6446_v63 = vld [vmem:[#allocation3_spill] sm:$0xff]  ;;  %v6448_v0 = vld [vmem:[#allocation41_spill] sm:$0xff] }
 0x1ed   : > { %3183 = vst.msk [vmem:[%s5955_s16 + $0xa8] sm:$0xff] %vm3161_vm4, %v3150_v9  ;;  %v3016_v16 = vadd.f32 %v2945_v10, %v2745_v27  ;;  %v2748_v32 = vadd.f32 %v4297_v42, %v2476_v51  ;;  %v2684_v23 = vpop.f32.mrf.mxu1  ;;  %v4350_v25 = vpop.f32.mrf.mxu0  ;;  %v2480_v47 = vadd.f32 %v6445_v20, %v2212_v59  ;;  %v2213_v28 = vadd.f32 %v5928_v1, %v6446_v63 }
 0x1ee   : > { %v3149_v55 = vsel %vm3085_vm11, %v3053_v40, %v3117_v38  ;;  %vm3088_vm12 = vcmp.gt.f32.partialorder %v3056_v52, 0.0  ;;  %v3120_v4 = vmul.f32 0.1, %v3056_v52  ;;  %v2747_v13 = vadd.f32 %v2684_v23, %v2475_v49 }
 0x1ef   : > { %3182 = vst.msk [vmem:[%s5955_s16 + $0xa0] sm:$0xff] %vm3161_vm4, %v3149_v55  ;;  %v3055_v22 = vadd.f32 %v5942_v43, %v3016_v16  ;;  %v3019_v11 = vadd.f32 %v4347_v41, %v2748_v32  ;;  %v4300_v12 = vpop.f32.mrf.mxu1  ;;  %v2965_v30 = vpop.f32.mrf.mxu0  ;;  %v2479_v54 = vadd.f32 %v6447_v3, %v2211_v35  ;;  %v2482_v40 = vadd.f32 %v6448_v0, %v2214_v44 }
 0x1f0   : > { %v3152_v17 = vsel %vm3088_vm12, %v3056_v52, %v3120_v4  ;;  %v3018_v18 = vadd.f32 %v2955_v33, %v2747_v13  ;;  %v2750_v5 = vadd.f32 %v4300_v12, %v2478_v48  ;;  %v2481_v14 = vadd.f32 %v6449_v46, %v2213_v28 }
 0x1f1   : > { %3185 = vst.msk [vmem:[%s5955_s16 + $0xb8] sm:$0xff] %vm3161_vm4, %v3152_v17  ;;  %vm3087_vm13 = vcmp.gt.f32.partialorder %v3055_v22, 0.0  ;;  %v3119_v53 = vmul.f32 0.1, %v3055_v22  ;;  %v3058_v2 = vadd.f32 %v5942_v43, %v3019_v11  ;;  %v2694_v34 = vpop.f32.mrf.mxu1  ;;  %v4353_v51 = vpop.f32.mrf.mxu0 }
 0x1f2   : > { %v3057_v56 = vadd.f32 %v5942_v43, %v3018_v18  ;;  %v3021_v36 = vadd.f32 %v4350_v25, %v2750_v5  ;;  %v2749_v8 = vadd.f32 %v2694_v34, %v2477_v29 }
 0x1f3   : > { %v3151_v24 = vsel %vm3087_vm13, %v3055_v22, %v3119_v53  ;;  %vm3090_vm14 = vcmp.gt.f32.partialorder %v3058_v2, 0.0  ;;  %v3122_v7 = vmul.f32 0.1, %v3058_v2  ;;  %v4303_v10 = vpop.f32.mrf.mxu1  ;;  %v2975_v50 = vpop.f32.mrf.mxu0 }
 0x1f4   : > { %3184 = vst.msk [vmem:[%s5955_s16 + $0xb0] sm:$0xff] %vm3161_vm4, %v3151_v24  ;;  %vm3089_vm15 = vcmp.gt.f32.partialorder %v3057_v56, 0.0  ;;  %v3121_v61 = vmul.f32 0.1, %v3057_v56  ;;  %v3060_v39 = vadd.f32 %v5942_v43, %v3021_v36  ;;  %v3020_v45 = vadd.f32 %v2965_v30, %v2749_v8 }
 0x1f5   : > { %v3154_v60 = vsel %vm3090_vm14, %v3058_v2, %v3122_v7  ;;  %v2752_v1 = vadd.f32 %v4303_v10, %v2480_v47  ;;  %v2704_v41 = vpop.f32.mrf.mxu1  ;;  %v4356_v9 = vpop.f32.mrf.mxu0 }
 0x1f6   : > { %3187 = vst.msk [vmem:[%s5955_s16 + $0xc8] sm:$0xff] %vm3161_vm4, %v3154_v60  ;;  %v3153_v26 = vsel %vm3089_vm15, %v3057_v56, %v3121_v61  ;;  %vm3092_vm0 = vcmp.gt.f32.partialorder %v3060_v39, 0.0  ;;  %v3124_v49 = vmul.f32 0.1, %v3060_v39  ;;  %v3059_v19 = vadd.f32 %v5942_v43, %v3020_v45 }
 0x1f7   : > { %3186 = vst.msk [vmem:[%s5955_s16 + $0xc0] sm:$0xff] %vm3161_vm4, %v3153_v26  ;;  %v3023_v57 = vadd.f32 %v4353_v51, %v2752_v1  ;;  %v2751_v27 = vadd.f32 %v2704_v41, %v2479_v54  ;;  %v4306_v42 = vpop.f32.mrf.mxu1  ;;  %v2985_v55 = vpop.f32.mrf.mxu0 }
 0x1f8   : > { %v3156_v38 = vsel %vm3092_vm0, %v3060_v39, %v3124_v49  ;;  %vm3091_vm1 = vcmp.gt.f32.partialorder %v3059_v19, 0.0  ;;  %v3123_v52 = vmul.f32 0.1, %v3059_v19  ;;  %v2754_v33 = vadd.f32 %v4306_v42, %v2482_v40 }
 0x1f9   : > { %3189 = vst.msk [vmem:[%s5955_s16 + $0xd8] sm:$0xff] %vm3161_vm4, %v3156_v38  ;;  %v3062_v21 = vadd.f32 %v5942_v43, %v3023_v57  ;;  %v3022_v48 = vadd.f32 %v2975_v50, %v2751_v27  ;;  %v2714_v6 = vpop.f32.mrf.mxu1 }
 0x1fa   : > { %v3155_v58 = vsel %vm3091_vm1, %v3059_v19, %v3123_v52  ;;  %v3025_v59 = vadd.f32 %v4356_v9, %v2754_v33  ;;  %v2753_v16 = vadd.f32 %v2714_v6, %v2481_v14 }
 0x1fb   : > { %3188 = vst.msk [vmem:[%s5955_s16 + $0xd0] sm:$0xff] %vm3161_vm4, %v3155_v58  ;;  %vm3094_vm2 = vcmp.gt.f32.partialorder %v3062_v21, 0.0  ;;  %v3126_v32 = vmul.f32 0.1, %v3062_v21  ;;  %v3061_v23 = vadd.f32 %v5942_v43, %v3022_v48 }
 0x1fc   : > { %v3064_v4 = vadd.f32 %v5942_v43, %v3025_v59  ;;  %v3024_v13 = vadd.f32 %v2985_v55, %v2753_v16 }
 0x1fd   : > { %v3158_v25 = vsel %vm3094_vm2, %v3062_v21, %v3126_v32  ;;  %vm3093_vm3 = vcmp.gt.f32.partialorder %v3061_v23, 0.0  ;;  %v3125_v31 = vmul.f32 0.1, %v3061_v23 }
 0x1fe   : > { %3191 = vst.msk [vmem:[%s5955_s16 + $0xe8] sm:$0xff] %vm3161_vm4, %v3158_v25  ;;  %vm3096_vm5 = vcmp.gt.f32.partialorder %v3064_v4, 0.0  ;;  %v3128_v29 = vmul.f32 0.1, %v3064_v4  ;;  %v3063_v22 = vadd.f32 %v5942_v43, %v3024_v13 }
 0x1ff   : > { %v3157_v11 = vsel %vm3093_vm3, %v3061_v23, %v3125_v31 }
 0x200   : > { %3190 = vst.msk [vmem:[%s5955_s16 + $0xe0] sm:$0xff] %vm3161_vm4, %v3157_v11  ;;  %v3160_v12 = vsel %vm3096_vm5, %v3064_v4, %v3128_v29  ;;  %vm3095_vm6 = vcmp.gt.f32.partialorder %v3063_v22, 0.0  ;;  %v3127_v37 = vmul.f32 0.1, %v3063_v22 }
 0x201   : > { %3193 = vst.msk [vmem:[%s5955_s16 + $0xf8] sm:$0xff] %vm3161_vm4, %v3160_v12 }
 0x202   : > { %v3159_v15 = vsel %vm3095_vm6, %v3063_v22, %v3127_v37 }
 0x203   : > { %3192 = vst.msk [vmem:[%s5955_s16 + $0xf0] sm:$0xff] %vm3161_vm4, %v3159_v15 }
 0x204 PF: > { %s13_s12 = sadd.s32 1, %s4374_s12  }
 0x205   : > { %p10_p4 = scmp.ge.s32.totalorder %s13_s12, 4  }
 0x207   :  { %12 = sbr.rel (!%p10_p4) target bundleno = 1 (0x1), region = 70 }

</bundles_post_ra>
